<compile_context>
chip_gen: v5e
topology: v5e:2x2
jax: 0.10.0
libtpu: 0.0.40
codegen_flags: <defaults>
</compile_context>

<pallas_src>
import functools

import jax
import jax.numpy as jnp
from jax.experimental import pallas as pl
from jax.experimental.pallas import tpu as pltpu


def _net_kernel(x1_ref, x2_ref, wt_ref, b_ref,
                res_ref, f1_ref, f2_ref, acc_ref, *, inv_hw):
    # x1_ref, x2_ref : (B_t, C_t, HW)   feature-map tiles, NCHW layout (HW in lanes)
    # wt_ref         : (C_t, classes_p) pre-transposed, lane-padded weight tile
    # b_ref          : (1, classes_p)   lane-padded bias
    # res_ref        : (B_t, classes_p) logits (written on last C-tile)
    # f1_ref, f2_ref : (B_t, C_t)       pooled features for this C-tile
    # acc_ref        : (B_t, classes_p) f32 classifier accumulator (VMEM scratch)
    c = pl.program_id(1)

    # Global average pool: spatial (HW) sits in the lane axis -> cross-lane
    # reduce (XLU). Accumulate in f32 regardless of the input dtype.
    f1 = jnp.sum(x1_ref[...].astype(jnp.float32), axis=-1) * inv_hw  # (B_t, C_t)
    f2 = jnp.sum(x2_ref[...].astype(jnp.float32), axis=-1) * inv_hw  # (B_t, C_t)
    f1_ref[...] = f1
    f2_ref[...] = f2

    # Classifier: accumulate f2-tile @ W-tile over the C (reduction) grid axis.
    @pl.when(c == 0)
    def _():
        acc_ref[...] = jnp.zeros_like(acc_ref)

    acc_ref[...] += jnp.dot(f2, wt_ref[...], preferred_element_type=jnp.float32)

    @pl.when(c == pl.num_programs(1) - 1)
    def _():
        res_ref[...] = acc_ref[...] + b_ref[...]


def _pick_c_tile(C):
    for t in (512, 256, 128):
        if C > t and C % t == 0:
            return t
    return C


def net_forward(x1_nchw, x2_nchw, weight, bias):
    """x1_nchw, x2_nchw: (B, C, H, W) backbone feature maps (f32 or bf16).
    weight: (classes, C), bias: (classes,)  [PyTorch nn.Linear convention].
    Returns [res (B, classes), f1 (B, C), f2 (B, C)] in float32."""
    B, C, H, W = x1_nchw.shape
    assert x2_nchw.shape == (B, C, H, W)
    classes = weight.shape[0]
    HW = H * W
    classes_p = pl.cdiv(classes, 128) * 128  # lane-dense classifier output

    # Free reshape (contiguous NCHW -> (B, C, HW)); NO transpose, no extra HBM pass.
    x1 = x1_nchw.reshape(B, C, HW)
    x2 = x2_nchw.reshape(B, C, HW)

    # Tiny one-time layout plumbing in the wrapper: transpose + lane-pad weight/bias.
    wt = jnp.pad(jnp.transpose(weight).astype(jnp.float32),
                 ((0, 0), (0, classes_p - classes)))          # (C, classes_p)
    b2d = jnp.pad(bias.astype(jnp.float32),
                  (0, classes_p - classes)).reshape(1, classes_p)

    c_tile = _pick_c_tile(C)
    b_tile = 8 if (B > 8 and B % 8 == 0) else B
    num_b = B // b_tile
    num_c = C // c_tile

    kernel = functools.partial(_net_kernel, inv_hw=1.0 / HW)

    out_shapes = (
        jax.ShapeDtypeStruct((B, classes_p), jnp.float32),  # res (padded)
        jax.ShapeDtypeStruct((B, C), jnp.float32),          # f1
        jax.ShapeDtypeStruct((B, C), jnp.float32),          # f2
    )

    res_p, f1, f2 = pl.pallas_call(
        kernel,
        out_shape=out_shapes,
        grid_spec=pltpu.PrefetchScalarGridSpec(
            num_scalar_prefetch=0,
            grid=(num_b, num_c),  # C (classifier reduction) is the last axis
            in_specs=[
                pl.BlockSpec((b_tile, c_tile, HW), lambda b, c: (b, c, 0)),
                pl.BlockSpec((b_tile, c_tile, HW), lambda b, c: (b, c, 0)),
                pl.BlockSpec((c_tile, classes_p), lambda b, c: (c, 0)),
                pl.BlockSpec((1, classes_p), lambda b, c: (0, 0)),
            ],
            out_specs=[
                pl.BlockSpec((b_tile, classes_p), lambda b, c: (b, 0)),  # accumulator-resident
                pl.BlockSpec((b_tile, c_tile), lambda b, c: (b, c)),
                pl.BlockSpec((b_tile, c_tile), lambda b, c: (b, c)),
            ],
            scratch_shapes=[pltpu.VMEM((b_tile, classes_p), jnp.float32)],
        ),
        compiler_params=pltpu.CompilerParams(
            dimension_semantics=("parallel", "arbitrary"),
        ),
    )(x1, x2, wt, b2d)

    res = res_p[:, :classes] if classes_p != classes else res_p
    return [res, f1, f2]


if __name__ == "__main__":
    # Small shapes consistent with the module's forward (backbone feature maps).
    # classes_num=200 matches Net's default and exercises the lane-padding path.
    B, C, H, W = 4, 256, 8, 8
    CLASSES = 200

    key = jax.random.PRNGKey(0)
    k1, k2, kw, kb = jax.random.split(key, 4)
    x1 = jax.random.normal(k1, (B, C, H, W), dtype=jnp.float32)
    x2 = jax.random.normal(k2, (B, C, H, W), dtype=jnp.float32)
    weight = jax.random.normal(kw, (CLASSES, C), dtype=jnp.float32) * 0.02
    bias = jax.random.normal(kb, (CLASSES,), dtype=jnp.float32) * 0.02

    res, f1, f2 = net_forward(x1, x2, weight, bias)
    jax.block_until_ready((res, f1, f2))

    # Pure-JAX reference check
    f1_ref = jnp.mean(x1.reshape(B, C, H * W), axis=-1)
    f2_ref = jnp.mean(x2.reshape(B, C, H * W), axis=-1)
    res_ref = f2_ref @ weight.T + bias
    assert jnp.allclose(f1, f1_ref, atol=1e-5, rtol=1e-5)
    assert jnp.allclose(f2, f2_ref, atol=1e-5, rtol=1e-5)
    assert jnp.allclose(res, res_ref, atol=1e-4, rtol=1e-4)

    print("KERNEL_OK")
</pallas_src>

<mosaic_0001>
module attributes {stable_mosaic.version = 11 : i64} {
  func.func @_net_kernel(%arg0: i32, %arg1: i32, %arg2: memref<4x128x64xf32, #tpu.memory_space<vmem>>, %arg3: memref<4x128x64xf32, #tpu.memory_space<vmem>>, %arg4: memref<128x256xf32, #tpu.memory_space<vmem>>, %arg5: memref<1x256xf32, #tpu.memory_space<vmem>>, %arg6: memref<4x256xf32, #tpu.memory_space<vmem>>, %arg7: memref<4x128xf32, #tpu.memory_space<vmem>>, %arg8: memref<4x128xf32, #tpu.memory_space<vmem>>, %arg9: memref<4x256xf32, #tpu.memory_space<vmem>>) attributes {dimension_semantics = [#tpu.dimension_semantics<parallel>, #tpu.dimension_semantics<arbitrary>], iteration_bounds = array<i64: 1, 2>, scalar_prefetch = 0 : i64, scratch_operands = 1 : i64, tpu.core_type = #tpu.core_type<tc>, window_params = [{transform_indices = @transform_0, window_bounds = array<i64: 4, 128, 64>}, {transform_indices = @transform_1, window_bounds = array<i64: 4, 128, 64>}, {transform_indices = @transform_2, window_bounds = array<i64: 128, 256>}, {pipeline_mode = #tpu.pipeline_mode<synchronous>, transform_indices = @transform_3, window_bounds = array<i64: 1, 256>}, {transform_indices = @transform_4, window_bounds = array<i64: 4, 256>}, {transform_indices = @transform_5, window_bounds = array<i64: 4, 128>}, {transform_indices = @transform_6, window_bounds = array<i64: 4, 128>}]} {
    %c0 = arith.constant 0 : index
    %c0_0 = arith.constant 0 : index
    %c0_1 = arith.constant 0 : index
    %0 = vector.load %arg2[%c0, %c0_0, %c0_1] : memref<4x128x64xf32, #tpu.memory_space<vmem>>, vector<4x128x64xf32>
    %cst = arith.constant dense<0.000000e+00> : vector<4x128xf32>
    %1 = vector.multi_reduction <add>, %0, %cst [2] : vector<4x128x64xf32> to vector<4x128xf32>
    %cst_2 = arith.constant 1.562500e-02 : f32
    %2 = vector.broadcast %cst_2 : f32 to vector<4x128xf32>
    %3 = arith.mulf %1, %2 : vector<4x128xf32>
    %c0_3 = arith.constant 0 : index
    %c0_4 = arith.constant 0 : index
    %c0_5 = arith.constant 0 : index
    %4 = vector.load %arg3[%c0_3, %c0_4, %c0_5] : memref<4x128x64xf32, #tpu.memory_space<vmem>>, vector<4x128x64xf32>
    %cst_6 = arith.constant dense<0.000000e+00> : vector<4x128xf32>
    %5 = vector.multi_reduction <add>, %4, %cst_6 [2] : vector<4x128x64xf32> to vector<4x128xf32>
    %cst_7 = arith.constant 1.562500e-02 : f32
    %6 = vector.broadcast %cst_7 : f32 to vector<4x128xf32>
    %7 = arith.mulf %5, %6 : vector<4x128xf32>
    %c0_8 = arith.constant 0 : index
    %c0_9 = arith.constant 0 : index
    %8 = vector.load %arg7[%c0_8, %c0_9] : memref<4x128xf32, #tpu.memory_space<vmem>>, vector<4x128xf32>
    tpu.vector_store %arg7[%c0_8, %c0_9], %3 {strides = array<i32>} : memref<4x128xf32, #tpu.memory_space<vmem>>, vector<4x128xf32>,
    %c0_10 = arith.constant 0 : index
    %c0_11 = arith.constant 0 : index
    %9 = vector.load %arg8[%c0_10, %c0_11] : memref<4x128xf32, #tpu.memory_space<vmem>>, vector<4x128xf32>
    tpu.vector_store %arg8[%c0_10, %c0_11], %7 {strides = array<i32>} : memref<4x128xf32, #tpu.memory_space<vmem>>, vector<4x128xf32>,
    %c0_i32 = arith.constant 0 : i32
    %10 = arith.cmpi eq, %arg1, %c0_i32 : i32
    %11 = arith.extui %10 : i1 to i32
    %c0_i32_12 = arith.constant 0 : i32
    %12 = arith.cmpi ne, %11, %c0_i32_12 : i32
    scf.if %12 {
      %cst_21 = arith.constant 0.000000e+00 : f32
      %21 = vector.broadcast %cst_21 : f32 to vector<4x256xf32>
      %c0_22 = arith.constant 0 : index
      %c0_23 = arith.constant 0 : index
      %22 = vector.load %arg9[%c0_22, %c0_23] : memref<4x256xf32, #tpu.memory_space<vmem>>, vector<4x256xf32>
      tpu.vector_store %arg9[%c0_22, %c0_23], %21 {strides = array<i32>} : memref<4x256xf32, #tpu.memory_space<vmem>>, vector<4x256xf32>,
    } else {
    }
    %c0_13 = arith.constant 0 : index
    %c0_14 = arith.constant 0 : index
    %13 = vector.load %arg9[%c0_13, %c0_14] : memref<4x256xf32, #tpu.memory_space<vmem>>, vector<4x256xf32>
    %c0_15 = arith.constant 0 : index
    %c0_16 = arith.constant 0 : index
    %14 = vector.load %arg4[%c0_15, %c0_16] : memref<128x256xf32, #tpu.memory_space<vmem>>, vector<128x256xf32>
    %cst_17 = arith.constant dense<0.000000e+00> : vector<4x256xf32>
    %15 = tpu.matmul %7, %14, %cst_17 {dimension_numbers = #tpu.dot_dimension_numbers<[1], [0], [0], [1], [0, 0, 1, 1], [], []>} : vector<4x128xf32>, vector<128x256xf32>, vector<4x256xf32> -> vector<4x256xf32>
    %16 = arith.addf %13, %15 : vector<4x256xf32>
    %c0_18 = arith.constant 0 : index
    %c0_19 = arith.constant 0 : index
    %17 = vector.load %arg9[%c0_18, %c0_19] : memref<4x256xf32, #tpu.memory_space<vmem>>, vector<4x256xf32>
    tpu.vector_store %arg9[%c0_18, %c0_19], %16 {strides = array<i32>} : memref<4x256xf32, #tpu.memory_space<vmem>>, vector<4x256xf32>,
    %c1_i32 = arith.constant 1 : i32
    %18 = arith.cmpi eq, %arg1, %c1_i32 : i32
    %19 = arith.extui %18 : i1 to i32
    %c0_i32_20 = arith.constant 0 : i32
    %20 = arith.cmpi ne, %19, %c0_i32_20 : i32
    scf.if %20 {
      %c0_21 = arith.constant 0 : index
      %c0_22 = arith.constant 0 : index
      %21 = vector.load %arg9[%c0_21, %c0_22] : memref<4x256xf32, #tpu.memory_space<vmem>>, vector<4x256xf32>
      %c0_23 = arith.constant 0 : index
      %c0_24 = arith.constant 0 : index
      %22 = vector.load %arg5[%c0_23, %c0_24] : memref<1x256xf32, #tpu.memory_space<vmem>>, vector<1x256xf32>
      %23 = vector.broadcast %22 : vector<1x256xf32> to vector<4x256xf32>
      %24 = arith.addf %21, %23 : vector<4x256xf32>
      %c0_25 = arith.constant 0 : index
      %c0_26 = arith.constant 0 : index
      %25 = vector.load %arg6[%c0_25, %c0_26] : memref<4x256xf32, #tpu.memory_space<vmem>>, vector<4x256xf32>
      tpu.vector_store %arg6[%c0_25, %c0_26], %24 {strides = array<i32>} : memref<4x256xf32, #tpu.memory_space<vmem>>, vector<4x256xf32>,
    } else {
    }
    return
  }
  func.func @transform_0(%arg0: i32, %arg1: i32) -> (i32, i32, i32) {
    %c0_i32 = arith.constant 0 : i32
    %c0_i32_0 = arith.constant 0 : i32
    return %arg0, %arg1, %c0_i32 : i32, i32, i32
  }
  func.func @transform_1(%arg0: i32, %arg1: i32) -> (i32, i32, i32) {
    %c0_i32 = arith.constant 0 : i32
    %c0_i32_0 = arith.constant 0 : i32
    return %arg0, %arg1, %c0_i32 : i32, i32, i32
  }
  func.func @transform_2(%arg0: i32, %arg1: i32) -> (i32, i32) {
    %c0_i32 = arith.constant 0 : i32
    %c0_i32_0 = arith.constant 0 : i32
    return %arg1, %c0_i32 : i32, i32
  }
  func.func @transform_3(%arg0: i32, %arg1: i32) -> (i32, i32) {
    %c0_i32 = arith.constant 0 : i32
    %c0_i32_0 = arith.constant 0 : i32
    %c0_i32_1 = arith.constant 0 : i32
    return %c0_i32, %c0_i32_0 : i32, i32
  }
  func.func @transform_4(%arg0: i32, %arg1: i32) -> (i32, i32) {
    %c0_i32 = arith.constant 0 : i32
    %c0_i32_0 = arith.constant 0 : i32
    return %arg0, %c0_i32 : i32, i32
  }
  func.func @transform_5(%arg0: i32, %arg1: i32) -> (i32, i32) {
    %c0_i32 = arith.constant 0 : i32
    return %arg0, %arg1 : i32, i32
  }
  func.func @transform_6(%arg0: i32, %arg1: i32) -> (i32, i32) {
    %c0_i32 = arith.constant 0 : i32
    return %arg0, %arg1 : i32, i32
  }
}

</mosaic_0001>

<bundles_post_ra>
// kernel: tpu_custom_call.1
= control target key start
LH: loop header
LB: loop body
LE: loop exit
PB: predicated region body
PF: predicated region fallthrough
CT: control target
= control target key end

     0   :  { %s3625_s0 = inlined_call_operand.vmem [shape: f32[4,256,64], index: 0, kind: input, shape index: {}]   ;;  %s3626_s1 = inlined_call_operand.vmem [shape: f32[4,256,64], index: 1, kind: input, shape index: {}]   ;;  %s3627_s2 = inlined_call_operand.vmem [shape: f32[256,256], index: 2, kind: input, shape index: {}]   ;;  %s3628_s3 = inlined_call_operand.vmem [shape: f32[1,256], index: 3, kind: input, shape index: {}]   ;;  %s3629_s4 = inlined_call_operand.hbm [shape: f32[4,256], index: 4, kind: output, shape index: {0}]   ;;  %s3630_s5 = inlined_call_operand.hbm [shape: f32[4,256], index: 5, kind: output, shape index: {1}]   ;;  %s3631_s6 = inlined_call_operand.hbm [shape: f32[4,256], index: 6, kind: output, shape index: {2}]  }
   0x1   :  { %3639 = sst [smem:[#allocation12_spill]] %s3625_s0 }
   0x2   :  { %3640 = sst [smem:[#allocation13_spill]] %s3626_s1 }
   0x3   :  { %12 = vsyncpa [#allocation6], 0 }
   0x4   :  { %13 = vsyncpa [#allocation8], 0 }
   0x5   :  { %15 = vsyncpa [#allocation8 + $0x1], 0  ;;  %s2563_s21 = smov 0   ;;  %s2565_s22 = smov 0  }
   0x6   :  { %s2567_s23 = smov 0   ;;  %s2569_s24 = smov 0  }
   0x7   :  { %s2571_s25 = smov 0   ;;  %s2573_s26 = smov 0  }
   0x8 LB: > { %s2287_s27 = sadd.s32 4294967295, %s2524_s26   ;;  %s3637_s28 = sadd.s32 4294967294, %s2524_s26   ;;  %s2524_s26 = sphi %s2573_s26, %s21_s26   ;;  %s2520_s25 = sphi %s2571_s25, %s3665_s25   ;;  %s2516_s24 = sphi %s2569_s24, %s3664_s24   ;;  %s2512_s23 = sphi %s2567_s23, %s3663_s23   ;;  %s2508_s22 = sphi %s2565_s22, %s3662_s22   ;;  %s2504_s21 = sphi %s2563_s21, %s3661_s21  }
   0x9   : > { %s30_s29 = sadd.s32 1, %s2520_s25  ;;  %s42_s30 = sadd.s32 1, %s2512_s23 }
   0xa   : > { %p31_p0 = scmp.ge.s32.totalorder %s30_s29, 2  ;;  %p49_p1 = scmp.ne.s32.totalorder %s2512_s23, %s2508_s22 }
   0xb   : > { %p50_p2 = scmp.eq.s32.totalorder %s2524_s26, 0  ;;  %p2600_p3 = scmp.eq.s32.totalorder %s2287_s27, 1 }
   0xc   : > { %s3667_s29 = smov (%p31_p0, %s30_s29), 0  ;;  %p187_p6 = scmp.ne.s32.totalorder %s2508_s22, %s2504_s21 }
   0xd   : > { %p2606_p4 = por %p50_p2, %p49_p1  ;;  %p2612_p5 = por %p2600_p3, %p49_p1 }
   0xe   : > { %s38_s10 = ssub.s32 %s2520_s25, %s3667_s29  ;;  %p188_p8 = scmp.eq.s32.totalorder %s3637_s28, 1 }
   0xf   : > { %p40_p7 = scmp.eq.s32.totalorder %s38_s10, 0  ;;  %p2290_p10 = scmp.ge.s32.totalorder %s2524_s26, 2 }
  0x10   : > { %p2624_p9 = por %p188_p8, %p187_p6 }
  0x11   : > { %s2622_s11 = scalar_select %p40_p7, %s2512_s23, %s42_s30  }
  0x12   : > { %235 = sbr.rel (%p2290_p10) target bundleno = 171 (0xab), region = 20 }
  0x17   : > { %238 = sbr.rel (!%p2606_p4) target bundleno = 97 (0x61), region = 24  ;;  %s240_s13 = sand.u32 (%p2606_p4), 1, %s2512_s23  }
  0x18   : > { %s2315_s14 = sshll.u32 (%p2606_p4), %s2520_s25, 7  ;;  %s2291_s15 = sshll.u32 (%p2606_p4), %s240_s13, 9 }
  0x19   : > { %s3645_s0 = sld [smem:[#allocation12_spill]] (%p2606_p4)  ;;  %s2643_s19 = scalar_lea.vmem (%p2606_p4), [#allocation3], %s2291_s15 }
  0x1f   : > { %s2638_s18 = scalar_lea.vmem %s3645_s0, %s2315_s14 }
  0x20   : > { %v403_v0 = vld [vmem:[%s2638_s18] sm:$0xff]  ;;  %v405_v1 = vld [vmem:[%s2638_s18 + $0x8] sm:$0xff]  ;;  %v407_v2 = vld [vmem:[%s2638_s18 + $0x10] sm:$0xff] }
  0x21   : > { %404 = vst [vmem:[%s2643_s19] sm:$0xff] %v403_v0  ;;  %v409_v3 = vld [vmem:[%s2638_s18 + $0x18] sm:$0xff]  ;;  %v411_v4 = vld [vmem:[%s2638_s18 + $0x20] sm:$0xff]  ;;  %v413_v5 = vld [vmem:[%s2638_s18 + $0x28] sm:$0xff] }
  0x22   : > { %406 = vst [vmem:[%s2643_s19 + $0x8] sm:$0xff] %v405_v1  ;;  %v415_v6 = vld [vmem:[%s2638_s18 + $0x30] sm:$0xff]  ;;  %v417_v7 = vld [vmem:[%s2638_s18 + $0x38] sm:$0xff]  ;;  %v419_v8 = vld [vmem:[%s2638_s18 + $0x40] sm:$0xff] }
  0x23   : > { %408 = vst [vmem:[%s2643_s19 + $0x10] sm:$0xff] %v407_v2  ;;  %v421_v9 = vld [vmem:[%s2638_s18 + $0x48] sm:$0xff]  ;;  %v423_v10 = vld [vmem:[%s2638_s18 + $0x50] sm:$0xff]  ;;  %v425_v11 = vld [vmem:[%s2638_s18 + $0x58] sm:$0xff] }
  0x24   : > { %410 = vst [vmem:[%s2643_s19 + $0x18] sm:$0xff] %v409_v3  ;;  %v427_v12 = vld [vmem:[%s2638_s18 + $0x60] sm:$0xff]  ;;  %v429_v13 = vld [vmem:[%s2638_s18 + $0x68] sm:$0xff]  ;;  %v431_v14 = vld [vmem:[%s2638_s18 + $0x70] sm:$0xff] }
  0x25   : > { %412 = vst [vmem:[%s2643_s19 + $0x20] sm:$0xff] %v411_v4  ;;  %v433_v15 = vld [vmem:[%s2638_s18 + $0x78] sm:$0xff]  ;;  %v435_v16 = vld [vmem:[%s2638_s18 + $0x100] sm:$0xff]  ;;  %v437_v17 = vld [vmem:[%s2638_s18 + $0x108] sm:$0xff] }
  0x26   : > { %414 = vst [vmem:[%s2643_s19 + $0x28] sm:$0xff] %v413_v5  ;;  %v439_v18 = vld [vmem:[%s2638_s18 + $0x110] sm:$0xff]  ;;  %v441_v19 = vld [vmem:[%s2638_s18 + $0x118] sm:$0xff]  ;;  %v443_v20 = vld [vmem:[%s2638_s18 + $0x120] sm:$0xff] }
  0x27   : > { %416 = vst [vmem:[%s2643_s19 + $0x30] sm:$0xff] %v415_v6  ;;  %v445_v21 = vld [vmem:[%s2638_s18 + $0x128] sm:$0xff]  ;;  %v447_v22 = vld [vmem:[%s2638_s18 + $0x130] sm:$0xff]  ;;  %v449_v23 = vld [vmem:[%s2638_s18 + $0x138] sm:$0xff] }
  0x28   : > { %418 = vst [vmem:[%s2643_s19 + $0x38] sm:$0xff] %v417_v7  ;;  %v451_v24 = vld [vmem:[%s2638_s18 + $0x140] sm:$0xff]  ;;  %v453_v25 = vld [vmem:[%s2638_s18 + $0x148] sm:$0xff]  ;;  %v455_v26 = vld [vmem:[%s2638_s18 + $0x150] sm:$0xff] }
  0x29   : > { %420 = vst [vmem:[%s2643_s19 + $0x40] sm:$0xff] %v419_v8  ;;  %v457_v27 = vld [vmem:[%s2638_s18 + $0x158] sm:$0xff]  ;;  %v459_v28 = vld [vmem:[%s2638_s18 + $0x160] sm:$0xff]  ;;  %v461_v29 = vld [vmem:[%s2638_s18 + $0x168] sm:$0xff] }
  0x2a   : > { %422 = vst [vmem:[%s2643_s19 + $0x48] sm:$0xff] %v421_v9  ;;  %v463_v30 = vld [vmem:[%s2638_s18 + $0x170] sm:$0xff]  ;;  %v465_v31 = vld [vmem:[%s2638_s18 + $0x178] sm:$0xff]  ;;  %v467_v32 = vld [vmem:[%s2638_s18 + $0x200] sm:$0xff] }
  0x2b   : > { %424 = vst [vmem:[%s2643_s19 + $0x50] sm:$0xff] %v423_v10  ;;  %v469_v33 = vld [vmem:[%s2638_s18 + $0x208] sm:$0xff]  ;;  %v471_v34 = vld [vmem:[%s2638_s18 + $0x210] sm:$0xff]  ;;  %v473_v35 = vld [vmem:[%s2638_s18 + $0x218] sm:$0xff] }
  0x2c   : > { %426 = vst [vmem:[%s2643_s19 + $0x58] sm:$0xff] %v425_v11  ;;  %v475_v36 = vld [vmem:[%s2638_s18 + $0x220] sm:$0xff]  ;;  %v477_v37 = vld [vmem:[%s2638_s18 + $0x228] sm:$0xff]  ;;  %v479_v38 = vld [vmem:[%s2638_s18 + $0x230] sm:$0xff] }
  0x2d   : > { %428 = vst [vmem:[%s2643_s19 + $0x60] sm:$0xff] %v427_v12  ;;  %v481_v39 = vld [vmem:[%s2638_s18 + $0x238] sm:$0xff]  ;;  %v483_v40 = vld [vmem:[%s2638_s18 + $0x240] sm:$0xff]  ;;  %v485_v41 = vld [vmem:[%s2638_s18 + $0x248] sm:$0xff] }
  0x2e   : > { %430 = vst [vmem:[%s2643_s19 + $0x68] sm:$0xff] %v429_v13  ;;  %v487_v42 = vld [vmem:[%s2638_s18 + $0x250] sm:$0xff]  ;;  %v489_v43 = vld [vmem:[%s2638_s18 + $0x258] sm:$0xff]  ;;  %v491_v44 = vld [vmem:[%s2638_s18 + $0x260] sm:$0xff] }
  0x2f   : > { %432 = vst [vmem:[%s2643_s19 + $0x70] sm:$0xff] %v431_v14  ;;  %v493_v45 = vld [vmem:[%s2638_s18 + $0x268] sm:$0xff]  ;;  %v495_v46 = vld [vmem:[%s2638_s18 + $0x270] sm:$0xff]  ;;  %v497_v47 = vld [vmem:[%s2638_s18 + $0x278] sm:$0xff] }
  0x30   : > { %434 = vst [vmem:[%s2643_s19 + $0x78] sm:$0xff] %v433_v15  ;;  %v499_v48 = vld [vmem:[%s2638_s18 + $0x300] sm:$0xff]  ;;  %v501_v49 = vld [vmem:[%s2638_s18 + $0x308] sm:$0xff]  ;;  %v503_v50 = vld [vmem:[%s2638_s18 + $0x310] sm:$0xff] }
  0x31   : > { %436 = vst [vmem:[%s2643_s19 + $0x80] sm:$0xff] %v435_v16  ;;  %v505_v51 = vld [vmem:[%s2638_s18 + $0x318] sm:$0xff]  ;;  %v507_v52 = vld [vmem:[%s2638_s18 + $0x320] sm:$0xff]  ;;  %v509_v53 = vld [vmem:[%s2638_s18 + $0x328] sm:$0xff] }
  0x32   : > { %438 = vst [vmem:[%s2643_s19 + $0x88] sm:$0xff] %v437_v17  ;;  %v511_v54 = vld [vmem:[%s2638_s18 + $0x330] sm:$0xff]  ;;  %v513_v55 = vld [vmem:[%s2638_s18 + $0x338] sm:$0xff]  ;;  %v515_v56 = vld [vmem:[%s2638_s18 + $0x340] sm:$0xff] }
  0x33   : > { %440 = vst [vmem:[%s2643_s19 + $0x90] sm:$0xff] %v439_v18  ;;  %v517_v57 = vld [vmem:[%s2638_s18 + $0x348] sm:$0xff]  ;;  %v519_v58 = vld [vmem:[%s2638_s18 + $0x350] sm:$0xff]  ;;  %v521_v59 = vld [vmem:[%s2638_s18 + $0x358] sm:$0xff] }
  0x34   : > { %442 = vst [vmem:[%s2643_s19 + $0x98] sm:$0xff] %v441_v19  ;;  %v523_v60 = vld [vmem:[%s2638_s18 + $0x360] sm:$0xff]  ;;  %v525_v61 = vld [vmem:[%s2638_s18 + $0x368] sm:$0xff]  ;;  %v527_v62 = vld [vmem:[%s2638_s18 + $0x370] sm:$0xff] }
  0x35   : > { %444 = vst [vmem:[%s2643_s19 + $0xa0] sm:$0xff] %v443_v20  ;;  %v529_v63 = vld [vmem:[%s2638_s18 + $0x378] sm:$0xff] }
  0x36   : > { %446 = vst [vmem:[%s2643_s19 + $0xa8] sm:$0xff] %v445_v21 }
  0x37   : > { %448 = vst [vmem:[%s2643_s19 + $0xb0] sm:$0xff] %v447_v22 }
  0x38   : > { %450 = vst [vmem:[%s2643_s19 + $0xb8] sm:$0xff] %v449_v23 }
  0x39   : > { %452 = vst [vmem:[%s2643_s19 + $0xc0] sm:$0xff] %v451_v24 }
  0x3a   : > { %454 = vst [vmem:[%s2643_s19 + $0xc8] sm:$0xff] %v453_v25 }
  0x3b   : > { %456 = vst [vmem:[%s2643_s19 + $0xd0] sm:$0xff] %v455_v26 }
  0x3c   : > { %458 = vst [vmem:[%s2643_s19 + $0xd8] sm:$0xff] %v457_v27 }
  0x3d   : > { %460 = vst [vmem:[%s2643_s19 + $0xe0] sm:$0xff] %v459_v28 }
  0x3e   : > { %462 = vst [vmem:[%s2643_s19 + $0xe8] sm:$0xff] %v461_v29 }
  0x3f   : > { %464 = vst [vmem:[%s2643_s19 + $0xf0] sm:$0xff] %v463_v30 }
  0x40   : > { %466 = vst [vmem:[%s2643_s19 + $0xf8] sm:$0xff] %v465_v31 }
  0x41   : > { %468 = vst [vmem:[%s2643_s19 + $0x100] sm:$0xff] %v467_v32 }
  0x42   : > { %470 = vst [vmem:[%s2643_s19 + $0x108] sm:$0xff] %v469_v33 }
  0x43   : > { %472 = vst [vmem:[%s2643_s19 + $0x110] sm:$0xff] %v471_v34 }
  0x44   : > { %474 = vst [vmem:[%s2643_s19 + $0x118] sm:$0xff] %v473_v35 }
  0x45   : > { %476 = vst [vmem:[%s2643_s19 + $0x120] sm:$0xff] %v475_v36 }
  0x46   : > { %478 = vst [vmem:[%s2643_s19 + $0x128] sm:$0xff] %v477_v37 }
  0x47   : > { %480 = vst [vmem:[%s2643_s19 + $0x130] sm:$0xff] %v479_v38 }
  0x48   : > { %482 = vst [vmem:[%s2643_s19 + $0x138] sm:$0xff] %v481_v39 }
  0x49   : > { %484 = vst [vmem:[%s2643_s19 + $0x140] sm:$0xff] %v483_v40 }
  0x4a   : > { %486 = vst [vmem:[%s2643_s19 + $0x148] sm:$0xff] %v485_v41 }
  0x4b   : > { %488 = vst [vmem:[%s2643_s19 + $0x150] sm:$0xff] %v487_v42 }
  0x4c   : > { %490 = vst [vmem:[%s2643_s19 + $0x158] sm:$0xff] %v489_v43 }
  0x4d   : > { %492 = vst [vmem:[%s2643_s19 + $0x160] sm:$0xff] %v491_v44 }
  0x4e   : > { %494 = vst [vmem:[%s2643_s19 + $0x168] sm:$0xff] %v493_v45 }
  0x4f   : > { %496 = vst [vmem:[%s2643_s19 + $0x170] sm:$0xff] %v495_v46 }
  0x50   : > { %498 = vst [vmem:[%s2643_s19 + $0x178] sm:$0xff] %v497_v47 }
  0x51   : > { %500 = vst [vmem:[%s2643_s19 + $0x180] sm:$0xff] %v499_v48 }
  0x52   : > { %502 = vst [vmem:[%s2643_s19 + $0x188] sm:$0xff] %v501_v49 }
  0x53   : > { %504 = vst [vmem:[%s2643_s19 + $0x190] sm:$0xff] %v503_v50 }
  0x54   : > { %506 = vst [vmem:[%s2643_s19 + $0x198] sm:$0xff] %v505_v51 }
  0x55   : > { %508 = vst [vmem:[%s2643_s19 + $0x1a0] sm:$0xff] %v507_v52 }
  0x56   : > { %510 = vst [vmem:[%s2643_s19 + $0x1a8] sm:$0xff] %v509_v53 }
  0x57   : > { %512 = vst [vmem:[%s2643_s19 + $0x1b0] sm:$0xff] %v511_v54 }
  0x58   : > { %514 = vst [vmem:[%s2643_s19 + $0x1b8] sm:$0xff] %v513_v55 }
  0x59   : > { %516 = vst [vmem:[%s2643_s19 + $0x1c0] sm:$0xff] %v515_v56 }
  0x5a   : > { %518 = vst [vmem:[%s2643_s19 + $0x1c8] sm:$0xff] %v517_v57 }
  0x5b   : > { %520 = vst [vmem:[%s2643_s19 + $0x1d0] sm:$0xff] %v519_v58 }
  0x5c   : > { %522 = vst [vmem:[%s2643_s19 + $0x1d8] sm:$0xff] %v521_v59 }
  0x5d   : > { %524 = vst [vmem:[%s2643_s19 + $0x1e0] sm:$0xff] %v523_v60 }
  0x5e   : > { %526 = vst [vmem:[%s2643_s19 + $0x1e8] sm:$0xff] %v525_v61 }
  0x5f   : > { %528 = vst [vmem:[%s2643_s19 + $0x1f0] sm:$0xff] %v527_v62 }
  0x60   : > { %530 = vst [vmem:[%s2643_s19 + $0x1f8] sm:$0xff] %v529_v63 }
  0x61 PF: > { %536 = sbr.rel (!%p2606_p4) target bundleno = 171 (0xab), region = 62  ;;  %s538_s20 = sand.u32 (%p2606_p4), 1, %s2512_s23  }
  0x62   : > { %s2316_s21 = sshll.u32 (%p2606_p4), %s2520_s25, 7  ;;  %s2294_s30 = sshll.u32 (%p2606_p4), %s538_s20, 9 }
  0x63   : > { %s3646_s1 = sld [smem:[#allocation13_spill]] (%p2606_p4)  ;;  %s2782_s8 = scalar_lea.vmem (%p2606_p4), [#allocation4], %s2294_s30 }
  0x69   : > { %s2777_s14 = scalar_lea.vmem %s3646_s1, %s2316_s21 }
  0x6a   : > { %v701_v0 = vld [vmem:[%s2777_s14] sm:$0xff]  ;;  %v703_v1 = vld [vmem:[%s2777_s14 + $0x8] sm:$0xff]  ;;  %v705_v2 = vld [vmem:[%s2777_s14 + $0x10] sm:$0xff] }
  0x6b   : > { %702 = vst [vmem:[%s2782_s8] sm:$0xff] %v701_v0  ;;  %v707_v3 = vld [vmem:[%s2777_s14 + $0x18] sm:$0xff]  ;;  %v709_v4 = vld [vmem:[%s2777_s14 + $0x20] sm:$0xff]  ;;  %v711_v5 = vld [vmem:[%s2777_s14 + $0x28] sm:$0xff] }
  0x6c   : > { %704 = vst [vmem:[%s2782_s8 + $0x8] sm:$0xff] %v703_v1  ;;  %v713_v6 = vld [vmem:[%s2777_s14 + $0x30] sm:$0xff]  ;;  %v715_v7 = vld [vmem:[%s2777_s14 + $0x38] sm:$0xff]  ;;  %v717_v8 = vld [vmem:[%s2777_s14 + $0x40] sm:$0xff] }
  0x6d   : > { %706 = vst [vmem:[%s2782_s8 + $0x10] sm:$0xff] %v705_v2  ;;  %v719_v9 = vld [vmem:[%s2777_s14 + $0x48] sm:$0xff]  ;;  %v721_v10 = vld [vmem:[%s2777_s14 + $0x50] sm:$0xff]  ;;  %v723_v11 = vld [vmem:[%s2777_s14 + $0x58] sm:$0xff] }
  0x6e   : > { %708 = vst [vmem:[%s2782_s8 + $0x18] sm:$0xff] %v707_v3  ;;  %v725_v12 = vld [vmem:[%s2777_s14 + $0x60] sm:$0xff]  ;;  %v727_v13 = vld [vmem:[%s2777_s14 + $0x68] sm:$0xff]  ;;  %v729_v14 = vld [vmem:[%s2777_s14 + $0x70] sm:$0xff] }
  0x6f   : > { %710 = vst [vmem:[%s2782_s8 + $0x20] sm:$0xff] %v709_v4  ;;  %v731_v15 = vld [vmem:[%s2777_s14 + $0x78] sm:$0xff]  ;;  %v733_v16 = vld [vmem:[%s2777_s14 + $0x100] sm:$0xff]  ;;  %v735_v17 = vld [vmem:[%s2777_s14 + $0x108] sm:$0xff] }
  0x70   : > { %712 = vst [vmem:[%s2782_s8 + $0x28] sm:$0xff] %v711_v5  ;;  %v737_v18 = vld [vmem:[%s2777_s14 + $0x110] sm:$0xff]  ;;  %v739_v19 = vld [vmem:[%s2777_s14 + $0x118] sm:$0xff]  ;;  %v741_v20 = vld [vmem:[%s2777_s14 + $0x120] sm:$0xff] }
  0x71   : > { %714 = vst [vmem:[%s2782_s8 + $0x30] sm:$0xff] %v713_v6  ;;  %v743_v21 = vld [vmem:[%s2777_s14 + $0x128] sm:$0xff]  ;;  %v745_v22 = vld [vmem:[%s2777_s14 + $0x130] sm:$0xff]  ;;  %v747_v23 = vld [vmem:[%s2777_s14 + $0x138] sm:$0xff] }
  0x72   : > { %716 = vst [vmem:[%s2782_s8 + $0x38] sm:$0xff] %v715_v7  ;;  %v749_v24 = vld [vmem:[%s2777_s14 + $0x140] sm:$0xff]  ;;  %v751_v25 = vld [vmem:[%s2777_s14 + $0x148] sm:$0xff]  ;;  %v753_v26 = vld [vmem:[%s2777_s14 + $0x150] sm:$0xff] }
  0x73   : > { %718 = vst [vmem:[%s2782_s8 + $0x40] sm:$0xff] %v717_v8  ;;  %v755_v27 = vld [vmem:[%s2777_s14 + $0x158] sm:$0xff]  ;;  %v757_v28 = vld [vmem:[%s2777_s14 + $0x160] sm:$0xff]  ;;  %v759_v29 = vld [vmem:[%s2777_s14 + $0x168] sm:$0xff] }
  0x74   : > { %720 = vst [vmem:[%s2782_s8 + $0x48] sm:$0xff] %v719_v9  ;;  %v761_v30 = vld [vmem:[%s2777_s14 + $0x170] sm:$0xff]  ;;  %v763_v31 = vld [vmem:[%s2777_s14 + $0x178] sm:$0xff]  ;;  %v765_v32 = vld [vmem:[%s2777_s14 + $0x200] sm:$0xff] }
  0x75   : > { %722 = vst [vmem:[%s2782_s8 + $0x50] sm:$0xff] %v721_v10  ;;  %v767_v33 = vld [vmem:[%s2777_s14 + $0x208] sm:$0xff]  ;;  %v769_v34 = vld [vmem:[%s2777_s14 + $0x210] sm:$0xff]  ;;  %v771_v35 = vld [vmem:[%s2777_s14 + $0x218] sm:$0xff] }
  0x76   : > { %724 = vst [vmem:[%s2782_s8 + $0x58] sm:$0xff] %v723_v11  ;;  %v773_v36 = vld [vmem:[%s2777_s14 + $0x220] sm:$0xff]  ;;  %v775_v37 = vld [vmem:[%s2777_s14 + $0x228] sm:$0xff]  ;;  %v777_v38 = vld [vmem:[%s2777_s14 + $0x230] sm:$0xff] }
  0x77   : > { %726 = vst [vmem:[%s2782_s8 + $0x60] sm:$0xff] %v725_v12  ;;  %v779_v39 = vld [vmem:[%s2777_s14 + $0x238] sm:$0xff]  ;;  %v781_v40 = vld [vmem:[%s2777_s14 + $0x240] sm:$0xff]  ;;  %v783_v41 = vld [vmem:[%s2777_s14 + $0x248] sm:$0xff] }
  0x78   : > { %728 = vst [vmem:[%s2782_s8 + $0x68] sm:$0xff] %v727_v13  ;;  %v785_v42 = vld [vmem:[%s2777_s14 + $0x250] sm:$0xff]  ;;  %v787_v43 = vld [vmem:[%s2777_s14 + $0x258] sm:$0xff]  ;;  %v789_v44 = vld [vmem:[%s2777_s14 + $0x260] sm:$0xff] }
  0x79   : > { %730 = vst [vmem:[%s2782_s8 + $0x70] sm:$0xff] %v729_v14  ;;  %v791_v45 = vld [vmem:[%s2777_s14 + $0x268] sm:$0xff]  ;;  %v793_v46 = vld [vmem:[%s2777_s14 + $0x270] sm:$0xff]  ;;  %v795_v47 = vld [vmem:[%s2777_s14 + $0x278] sm:$0xff] }
  0x7a   : > { %732 = vst [vmem:[%s2782_s8 + $0x78] sm:$0xff] %v731_v15  ;;  %v797_v48 = vld [vmem:[%s2777_s14 + $0x300] sm:$0xff]  ;;  %v799_v49 = vld [vmem:[%s2777_s14 + $0x308] sm:$0xff]  ;;  %v801_v50 = vld [vmem:[%s2777_s14 + $0x310] sm:$0xff] }
  0x7b   : > { %734 = vst [vmem:[%s2782_s8 + $0x80] sm:$0xff] %v733_v16  ;;  %v803_v51 = vld [vmem:[%s2777_s14 + $0x318] sm:$0xff]  ;;  %v805_v52 = vld [vmem:[%s2777_s14 + $0x320] sm:$0xff]  ;;  %v807_v53 = vld [vmem:[%s2777_s14 + $0x328] sm:$0xff] }
  0x7c   : > { %736 = vst [vmem:[%s2782_s8 + $0x88] sm:$0xff] %v735_v17  ;;  %v809_v54 = vld [vmem:[%s2777_s14 + $0x330] sm:$0xff]  ;;  %v811_v55 = vld [vmem:[%s2777_s14 + $0x338] sm:$0xff]  ;;  %v813_v56 = vld [vmem:[%s2777_s14 + $0x340] sm:$0xff] }
  0x7d   : > { %738 = vst [vmem:[%s2782_s8 + $0x90] sm:$0xff] %v737_v18  ;;  %v815_v57 = vld [vmem:[%s2777_s14 + $0x348] sm:$0xff]  ;;  %v817_v58 = vld [vmem:[%s2777_s14 + $0x350] sm:$0xff]  ;;  %v819_v59 = vld [vmem:[%s2777_s14 + $0x358] sm:$0xff] }
  0x7e   : > { %740 = vst [vmem:[%s2782_s8 + $0x98] sm:$0xff] %v739_v19  ;;  %v821_v60 = vld [vmem:[%s2777_s14 + $0x360] sm:$0xff]  ;;  %v823_v61 = vld [vmem:[%s2777_s14 + $0x368] sm:$0xff]  ;;  %v825_v62 = vld [vmem:[%s2777_s14 + $0x370] sm:$0xff] }
  0x7f   : > { %742 = vst [vmem:[%s2782_s8 + $0xa0] sm:$0xff] %v741_v20  ;;  %v827_v63 = vld [vmem:[%s2777_s14 + $0x378] sm:$0xff] }
  0x80   : > { %744 = vst [vmem:[%s2782_s8 + $0xa8] sm:$0xff] %v743_v21 }
  0x81   : > { %746 = vst [vmem:[%s2782_s8 + $0xb0] sm:$0xff] %v745_v22 }
  0x82   : > { %748 = vst [vmem:[%s2782_s8 + $0xb8] sm:$0xff] %v747_v23 }
  0x83   : > { %750 = vst [vmem:[%s2782_s8 + $0xc0] sm:$0xff] %v749_v24 }
  0x84   : > { %752 = vst [vmem:[%s2782_s8 + $0xc8] sm:$0xff] %v751_v25 }
  0x85   : > { %754 = vst [vmem:[%s2782_s8 + $0xd0] sm:$0xff] %v753_v26 }
  0x86   : > { %756 = vst [vmem:[%s2782_s8 + $0xd8] sm:$0xff] %v755_v27 }
  0x87   : > { %758 = vst [vmem:[%s2782_s8 + $0xe0] sm:$0xff] %v757_v28 }
  0x88   : > { %760 = vst [vmem:[%s2782_s8 + $0xe8] sm:$0xff] %v759_v29 }
  0x89   : > { %762 = vst [vmem:[%s2782_s8 + $0xf0] sm:$0xff] %v761_v30 }
  0x8a   : > { %764 = vst [vmem:[%s2782_s8 + $0xf8] sm:$0xff] %v763_v31 }
  0x8b   : > { %766 = vst [vmem:[%s2782_s8 + $0x100] sm:$0xff] %v765_v32 }
  0x8c   : > { %768 = vst [vmem:[%s2782_s8 + $0x108] sm:$0xff] %v767_v33 }
  0x8d   : > { %770 = vst [vmem:[%s2782_s8 + $0x110] sm:$0xff] %v769_v34 }
  0x8e   : > { %772 = vst [vmem:[%s2782_s8 + $0x118] sm:$0xff] %v771_v35 }
  0x8f   : > { %774 = vst [vmem:[%s2782_s8 + $0x120] sm:$0xff] %v773_v36 }
  0x90   : > { %776 = vst [vmem:[%s2782_s8 + $0x128] sm:$0xff] %v775_v37 }
  0x91   : > { %778 = vst [vmem:[%s2782_s8 + $0x130] sm:$0xff] %v777_v38 }
  0x92   : > { %780 = vst [vmem:[%s2782_s8 + $0x138] sm:$0xff] %v779_v39 }
  0x93   : > { %782 = vst [vmem:[%s2782_s8 + $0x140] sm:$0xff] %v781_v40 }
  0x94   : > { %784 = vst [vmem:[%s2782_s8 + $0x148] sm:$0xff] %v783_v41 }
  0x95   : > { %786 = vst [vmem:[%s2782_s8 + $0x150] sm:$0xff] %v785_v42 }
  0x96   : > { %788 = vst [vmem:[%s2782_s8 + $0x158] sm:$0xff] %v787_v43 }
  0x97   : > { %790 = vst [vmem:[%s2782_s8 + $0x160] sm:$0xff] %v789_v44 }
  0x98   : > { %792 = vst [vmem:[%s2782_s8 + $0x168] sm:$0xff] %v791_v45 }
  0x99   : > { %794 = vst [vmem:[%s2782_s8 + $0x170] sm:$0xff] %v793_v46 }
  0x9a   : > { %796 = vst [vmem:[%s2782_s8 + $0x178] sm:$0xff] %v795_v47 }
  0x9b   : > { %798 = vst [vmem:[%s2782_s8 + $0x180] sm:$0xff] %v797_v48 }
  0x9c   : > { %800 = vst [vmem:[%s2782_s8 + $0x188] sm:$0xff] %v799_v49 }
  0x9d   : > { %802 = vst [vmem:[%s2782_s8 + $0x190] sm:$0xff] %v801_v50 }
  0x9e   : > { %804 = vst [vmem:[%s2782_s8 + $0x198] sm:$0xff] %v803_v51 }
  0x9f   : > { %806 = vst [vmem:[%s2782_s8 + $0x1a0] sm:$0xff] %v805_v52 }
  0xa0   : > { %808 = vst [vmem:[%s2782_s8 + $0x1a8] sm:$0xff] %v807_v53 }
  0xa1   : > { %810 = vst [vmem:[%s2782_s8 + $0x1b0] sm:$0xff] %v809_v54 }
  0xa2   : > { %812 = vst [vmem:[%s2782_s8 + $0x1b8] sm:$0xff] %v811_v55 }
  0xa3   : > { %814 = vst [vmem:[%s2782_s8 + $0x1c0] sm:$0xff] %v813_v56 }
  0xa4   : > { %816 = vst [vmem:[%s2782_s8 + $0x1c8] sm:$0xff] %v815_v57 }
  0xa5   : > { %818 = vst [vmem:[%s2782_s8 + $0x1d0] sm:$0xff] %v817_v58 }
  0xa6   : > { %820 = vst [vmem:[%s2782_s8 + $0x1d8] sm:$0xff] %v819_v59 }
  0xa7   : > { %822 = vst [vmem:[%s2782_s8 + $0x1e0] sm:$0xff] %v821_v60 }
  0xa8   : > { %824 = vst [vmem:[%s2782_s8 + $0x1e8] sm:$0xff] %v823_v61 }
  0xa9   : > { %826 = vst [vmem:[%s2782_s8 + $0x1f0] sm:$0xff] %v825_v62 }
  0xaa   : > { %828 = vst [vmem:[%s2782_s8 + $0x1f8] sm:$0xff] %v827_v63 }
  0xab PF: > { %p2297_p11 = scmp.ge.s32.totalorder %s2524_s26, 1  ;;  %p843_p12 = scmp.lt.s32.totalorder %s2524_s26, 3 }
  0xad   : > { %p844_p13 = pnand %p2297_p11, %p843_p12 }
  0xae   : > { %s850_s15 = sand.u32 (!%p844_p13), 1, %s2508_s22   ;;  %s2302_s21 = sshll.u32 (!%p844_p13), %s2516_s24, 4 }
  0xaf   : > { %847 = sbr.rel (%p844_p13) target bundleno = 852 (0x354), region = 104  ;;  %s2914_s16 = sshll.u32 (!%p844_p13), %s850_s15, 9 }
  0xb0   : > { %s2917_s17 = scalar_lea.vmem (!%p844_p13), [#allocation3], %s2914_s16  ;;  %s3129_s18 = scalar_lea.vmem (!%p844_p13), [#allocation4], %s2914_s16 }
  0xb1   : > { %s3321_s19 = sshll.u32 (!%p844_p13), %s850_s15, 2  ;;  %p906_p0 = scmp.lt.s32.totalorder (!%p844_p13), %s2302_s21, 31 }
  0xb2   : > { %s893_s20 = scalar_lea.vmem (!%p844_p13), [#allocation7], %s3321_s19  ;;  %s3638_s8 = scalar_lea.vmem (!%p844_p13), [#allocation9], %s3321_s19 }
  0xb3   : > { %p2305_p1 = scmp.ne.s32.totalorder (!%p844_p13), %s2516_s24, 0 }
  0xb4   : > { %vm976_vm0 = vcmask 523264   ;;  %v916_v0 = vld [vmem:[%s2917_s17 + $0x20] sm:$0xff]  ;;  %v914_v1 = vld [vmem:[%s2917_s17 + $0x10] sm:$0xff]  ;;  %v917_v6 = vld [vmem:[%s2917_s17 + $0x28] sm:$0xff]  ;;  %vm1622_vm1 = vcmask 130112   ;;  %vm1626_vm2 = vcmask 195712  }
  0xb5   : > { %v912_v2 = vld [vmem:[%s2917_s17] sm:$0xff]  ;;  %v989_v3 = vsel %vm976_vm0, %v916_v0, 0.0  ;;  %v983_v4 = vsel %vm976_vm0, %v914_v1, 0.0  ;;  %v915_v7 = vld [vmem:[%s2917_s17 + $0x18] sm:$0xff]  ;;  %v913_v8 = vld [vmem:[%s2917_s17 + $0x8] sm:$0xff]  ;;  %v992_v9 = vsel %vm976_vm0, %v917_v6, 0.0 }
  0xb6   : > { %v977_v5 = vsel %vm976_vm0, %v912_v2, 0.0  ;;  %990 = vadd.xlane.f32.xlu2 %v989_v3  ;;  %984 = vadd.xlane.f32.xlu1 %v983_v4  ;;  %v986_v10 = vsel %vm976_vm0, %v915_v7, 0.0  ;;  %v980_v11 = vsel %vm976_vm0, %v913_v8, 0.0  ;;  %v920_v12 = vld [vmem:[%s2917_s17 + $0x40] sm:$0xff]  ;;  %v919_v13 = vld [vmem:[%s2917_s17 + $0x38] sm:$0xff]  ;;  %v918_v14 = vld [vmem:[%s2917_s17 + $0x30] sm:$0xff] }
  0xb7   : > { %978 = vadd.xlane.f32.xlu0 %v977_v5  ;;  %v1001_v15 = vsel %vm976_vm0, %v920_v12, 0.0  ;;  %v998_v16 = vsel %vm976_vm0, %v919_v13, 0.0  ;;  %v995_v17 = vsel %vm976_vm0, %v918_v14, 0.0  ;;  %v923_v18 = vld [vmem:[%s2917_s17 + $0x58] sm:$0xff]  ;;  %v922_v19 = vld [vmem:[%s2917_s17 + $0x50] sm:$0xff]  ;;  %v921_v20 = vld [vmem:[%s2917_s17 + $0x48] sm:$0xff] }
  0xb8   : > { %v1010_v21 = vsel %vm976_vm0, %v923_v18, 0.0  ;;  %v1007_v22 = vsel %vm976_vm0, %v922_v19, 0.0  ;;  %v1004_v23 = vsel %vm976_vm0, %v921_v20, 0.0  ;;  %v926_v24 = vld [vmem:[%s2917_s17 + $0x70] sm:$0xff]  ;;  %v925_v25 = vld [vmem:[%s2917_s17 + $0x68] sm:$0xff]  ;;  %v924_v26 = vld [vmem:[%s2917_s17 + $0x60] sm:$0xff] }
  0xb9   : > { %v1019_v27 = vsel %vm976_vm0, %v926_v24, 0.0  ;;  %v1016_v28 = vsel %vm976_vm0, %v925_v25, 0.0  ;;  %v1013_v29 = vsel %vm976_vm0, %v924_v26, 0.0  ;;  %v929_v30 = vld [vmem:[%s2917_s17 + $0x88] sm:$0xff]  ;;  %v928_v31 = vld [vmem:[%s2917_s17 + $0x80] sm:$0xff]  ;;  %v927_v32 = vld [vmem:[%s2917_s17 + $0x78] sm:$0xff] }
  0xba   : > { %v1028_v33 = vsel %vm976_vm0, %v929_v30, 0.0  ;;  %v1025_v34 = vsel %vm976_vm0, %v928_v31, 0.0  ;;  %v1022_v35 = vsel %vm976_vm0, %v927_v32, 0.0  ;;  %v932_v36 = vld [vmem:[%s2917_s17 + $0xa0] sm:$0xff]  ;;  %v931_v37 = vld [vmem:[%s2917_s17 + $0x98] sm:$0xff]  ;;  %v930_v38 = vld [vmem:[%s2917_s17 + $0x90] sm:$0xff]  ;;  %v1617_v31 = vlaneseq }
  0xbb   : > { %v1037_v39 = vsel %vm976_vm0, %v932_v36, 0.0  ;;  %v1034_v40 = vsel %vm976_vm0, %v931_v37, 0.0  ;;  %v1031_v41 = vsel %vm976_vm0, %v930_v38, 0.0  ;;  %v935_v42 = vld [vmem:[%s2917_s17 + $0xb8] sm:$0xff]  ;;  %v934_v43 = vld [vmem:[%s2917_s17 + $0xb0] sm:$0xff]  ;;  %v933_v44 = vld [vmem:[%s2917_s17 + $0xa8] sm:$0xff] }
  0xbc   : > { %v1046_v45 = vsel %vm976_vm0, %v935_v42, 0.0  ;;  %v1043_v46 = vsel %vm976_vm0, %v934_v43, 0.0  ;;  %v1040_v47 = vsel %vm976_vm0, %v933_v44, 0.0  ;;  %v938_v48 = vld [vmem:[%s2917_s17 + $0xd0] sm:$0xff]  ;;  %v937_v49 = vld [vmem:[%s2917_s17 + $0xc8] sm:$0xff]  ;;  %v936_v50 = vld [vmem:[%s2917_s17 + $0xc0] sm:$0xff] }
  0xbd   : > { %v1055_v51 = vsel %vm976_vm0, %v938_v48, 0.0  ;;  %v1052_v52 = vsel %vm976_vm0, %v937_v49, 0.0  ;;  %v1049_v53 = vsel %vm976_vm0, %v936_v50, 0.0  ;;  %v941_v54 = vld [vmem:[%s2917_s17 + $0xe8] sm:$0xff]  ;;  %v940_v55 = vld [vmem:[%s2917_s17 + $0xe0] sm:$0xff]  ;;  %v939_v56 = vld [vmem:[%s2917_s17 + $0xd8] sm:$0xff] }
  0xbe   : > { %993 = vadd.xlane.f32.xlu2 %v992_v9  ;;  %987 = vadd.xlane.f32.xlu1 %v986_v10  ;;  %v1064_v57 = vsel %vm976_vm0, %v941_v54, 0.0  ;;  %v1061_v58 = vsel %vm976_vm0, %v940_v55, 0.0  ;;  %v1058_v59 = vsel %vm976_vm0, %v939_v56, 0.0  ;;  %v944_v60 = vld [vmem:[%s2917_s17 + $0x100] sm:$0xff]  ;;  %v943_v61 = vld [vmem:[%s2917_s17 + $0xf8] sm:$0xff]  ;;  %v942_v62 = vld [vmem:[%s2917_s17 + $0xf0] sm:$0xff] }
  0xbf   : > { %981 = vadd.xlane.f32.xlu0 %v980_v11  ;;  %v1073_v63 = vsel %vm976_vm0, %v944_v60, 0.0  ;;  %v1070_v0 = vsel %vm976_vm0, %v943_v61, 0.0  ;;  %v1067_v1 = vsel %vm976_vm0, %v942_v62, 0.0  ;;  %v947_v2 = vld [vmem:[%s2917_s17 + $0x118] sm:$0xff]  ;;  %v946_v3 = vld [vmem:[%s2917_s17 + $0x110] sm:$0xff]  ;;  %v945_v4 = vld [vmem:[%s2917_s17 + $0x108] sm:$0xff] }
  0xc0   : > { %v1082_v5 = vsel %vm976_vm0, %v947_v2, 0.0  ;;  %v1079_v6 = vsel %vm976_vm0, %v946_v3, 0.0  ;;  %v1076_v7 = vsel %vm976_vm0, %v945_v4, 0.0  ;;  %v950_v8 = vld [vmem:[%s2917_s17 + $0x130] sm:$0xff]  ;;  %v949_v9 = vld [vmem:[%s2917_s17 + $0x128] sm:$0xff]  ;;  %v948_v10 = vld [vmem:[%s2917_s17 + $0x120] sm:$0xff] }
  0xc1   : > { %v1091_v11 = vsel %vm976_vm0, %v950_v8, 0.0  ;;  %v1088_v12 = vsel %vm976_vm0, %v949_v9, 0.0  ;;  %v1085_v13 = vsel %vm976_vm0, %v948_v10, 0.0  ;;  %v953_v14 = vld [vmem:[%s2917_s17 + $0x148] sm:$0xff]  ;;  %v956_v20 = vld [vmem:[%s2917_s17 + $0x160] sm:$0xff]  ;;  %v959_v26 = vld [vmem:[%s2917_s17 + $0x178] sm:$0xff] }
  0xc2   : > { %v957_v30 = vld [vmem:[%s2917_s17 + $0x168] sm:$0xff]  ;;  %v3015_v36 = vand.u32 127, %v1617_v31  ;;  %v962_v37 = vld [vmem:[%s2917_s17 + $0x190] sm:$0xff]  ;;  %v960_v44 = vld [vmem:[%s2917_s17 + $0x180] sm:$0xff]  ;;  %vm1630_vm3 = vcmask 261312   ;;  %vm1634_vm4 = vcmask 326912  }
  0xc3   : > { %v961_v38 = vld [vmem:[%s2917_s17 + $0x188] sm:$0xff]  ;;  %v1121_v56 = vsel %vm976_vm0, %v960_v44, 0.0  ;;  %vm1638_vm5 = vcmask 392512   ;;  %v964_v3 = vld [vmem:[%s2917_s17 + $0x1a0] sm:$0xff]  ;;  %v963_v9 = vld [vmem:[%s2917_s17 + $0x198] sm:$0xff]  ;;  %vm1642_vm6 = vcmask 458112  }
  0xc4   : > { %v3023_v43 = vadd.s32 4294967288, %v3015_v36  ;;  %v3035_v54 = vadd.s32 4294967264, %v3015_v36  ;;  %v965_v2 = vld [vmem:[%s2917_s17 + $0x1a8] sm:$0xff]  ;;  %v3056_v8 = vadd.s32 4294967248, %v3015_v36  ;;  %vm1646_vm7 = vcmask 523712   ;;  %s3669_s21 = smov (!%p906_p0, %s2302_s21), 31 }
  0xc5   : > { %vm1650_vm8 = vcmask 589312   ;;  %v3079_v31 = vadd.s32 4294967224, %v3015_v36  ;;  %vm1654_vm9 = vcmask 654912   ;;  %vm1658_vm10 = vcmask 720512   ;;  %s2317_s30 = sshll.u32 %s3669_s21, 4 }
  0xc6   : > { %1002 = vadd.xlane.f32.xlu2 %v1001_v15  ;;  %999 = vadd.xlane.f32.xlu1 %v998_v16  ;;  %v952_v15 = vld [vmem:[%s2917_s17 + $0x140] sm:$0xff]  ;;  %v951_v16 = vld [vmem:[%s2917_s17 + $0x138] sm:$0xff]  ;;  %vm3634_vm11 = vcmask 786112   ;;  %vm3632_vm12 = vcmask 851712   ;;  %vm1670_vm13 = vcmask 917312   ;;  %vm1674_vm14 = vcmask 982912   ;;  %s3405_s14 = scalar_lea.vmem %s3627_s2, %s2317_s30 }
  0xc7   : > { %996 = vadd.xlane.f32.xlu0 %v995_v17  ;;  %v1100_v17 = vsel %vm976_vm0, %v953_v14, 0.0  ;;  %v1097_v18 = vsel %vm976_vm0, %v952_v15, 0.0  ;;  %v1094_v19 = vsel %vm976_vm0, %v951_v16, 0.0  ;;  %v1136_v16 = vsel %vm976_vm0, %v965_v2, 0.0 }
  0xc8   : > { %vm1678_vm15 = vcmask 1048512  }
  0xce   : > { %1011 = vadd.xlane.f32.xlu2 %v1010_v21  ;;  %1008 = vadd.xlane.f32.xlu1 %v1007_v22  ;;  %v955_v21 = vld [vmem:[%s2917_s17 + $0x158] sm:$0xff]  ;;  %v954_v22 = vld [vmem:[%s2917_s17 + $0x150] sm:$0xff] }
  0xcf   : > { %1005 = vadd.xlane.f32.xlu0 %v1004_v23  ;;  %v1109_v23 = vsel %vm976_vm0, %v956_v20, 0.0  ;;  %v1106_v24 = vsel %vm976_vm0, %v955_v21, 0.0  ;;  %v1103_v25 = vsel %vm976_vm0, %v954_v22, 0.0 }
  0xd6   : > { %1020 = vadd.xlane.f32.xlu2 %v1019_v27  ;;  %1017 = vadd.xlane.f32.xlu1 %v1016_v28  ;;  %v958_v27 = vld [vmem:[%s2917_s17 + $0x170] sm:$0xff] }
  0xd7   : > { %1014 = vadd.xlane.f32.xlu0 %v1013_v29 }
  0xde   : > { %1029 = vadd.xlane.f32.xlu2 %v1028_v33  ;;  %1026 = vadd.xlane.f32.xlu1 %v1025_v34  ;;  %v1118_v33 = vsel %vm976_vm0, %v959_v26, 0.0  ;;  %v1115_v34 = vsel %vm976_vm0, %v958_v27, 0.0  ;;  %v967_v26 = vld [vmem:[%s2917_s17 + $0x1b8] sm:$0xff]  ;;  %v3075_v27 = vadd.s32 4294967208, %v3015_v36 }
  0xdf   : > { %1023 = vadd.xlane.f32.xlu0 %v1022_v35  ;;  %v1112_v35 = vsel %vm976_vm0, %v957_v30, 0.0 }
  0xe6   : > { %1038 = vadd.xlane.f32.xlu2 %v1037_v39  ;;  %1035 = vadd.xlane.f32.xlu1 %v1034_v40 }
  0xe7   : > { %1032 = vadd.xlane.f32.xlu0 %v1031_v41  ;;  %v3020_v41 = vadd.s32 4294967272, %v3015_v36 }
  0xee   : > { %1047 = vadd.xlane.f32.xlu2 %v1046_v45  ;;  %1044 = vadd.xlane.f32.xlu1 %v1043_v46  ;;  %v3027_v45 = vadd.s32 4294967280, %v3015_v36 }
  0xef   : > { %1041 = vadd.xlane.f32.xlu0 %v1040_v47  ;;  %v3030_v47 = vadd.s32 4294967256, %v3015_v36 }
  0xf6   : > { %1056 = vadd.xlane.f32.xlu2 %v1055_v51  ;;  %1053 = vadd.xlane.f32.xlu1 %v1052_v52  ;;  %v1127_v52 = vsel %vm976_vm0, %v962_v37, 0.0 }
  0xf7   : > { %1050 = vadd.xlane.f32.xlu0 %v1049_v53  ;;  %v1124_v53 = vsel %vm976_vm0, %v961_v38, 0.0 }
  0xfe   : > { %1065 = vadd.xlane.f32.xlu2 %v1064_v57  ;;  %1062 = vadd.xlane.f32.xlu1 %v1061_v58 }
  0xff   : > { %1059 = vadd.xlane.f32.xlu0 %v1058_v59 }
 0x106   : > { %1074 = vadd.xlane.f32.xlu2 %v1073_v63  ;;  %1071 = vadd.xlane.f32.xlu1 %v1070_v0 }
 0x107   : > { %1068 = vadd.xlane.f32.xlu0 %v1067_v1  ;;  %v3047_v1 = vadd.s32 4294967240, %v3015_v36 }
 0x10e   : > { %1083 = vadd.xlane.f32.xlu2 %v1082_v5  ;;  %1080 = vadd.xlane.f32.xlu1 %v1079_v6  ;;  %v3053_v5 = vadd.s32 4294967232, %v3015_v36 }
 0x10f   : > { %1077 = vadd.xlane.f32.xlu0 %v1076_v7 }
 0x116   : > { %1092 = vadd.xlane.f32.xlu2 %v1091_v11  ;;  %1089 = vadd.xlane.f32.xlu1 %v1088_v12 }
 0x117   : > { %1086 = vadd.xlane.f32.xlu0 %v1085_v13 }
 0x11e   : > { %1101 = vadd.xlane.f32.xlu2 %v1100_v17  ;;  %1098 = vadd.xlane.f32.xlu1 %v1097_v18  ;;  %v1133_v17 = vsel %vm976_vm0, %v964_v3, 0.0 }
 0x11f   : > { %1095 = vadd.xlane.f32.xlu0 %v1094_v19  ;;  %v1130_v19 = vsel %vm976_vm0, %v963_v9, 0.0 }
 0x126   : > { %1110 = vadd.xlane.f32.xlu2 %v1109_v23  ;;  %1107 = vadd.xlane.f32.xlu1 %v1106_v24  ;;  %v3070_v24 = vadd.s32 4294967216, %v3015_v36 }
 0x127   : > { %1104 = vadd.xlane.f32.xlu0 %v1103_v25  ;;  %v968_v25 = vld [vmem:[%s2917_s17 + $0x1c0] sm:$0xff] }
 0x128   : > { %v1145_v38 = vsel %vm976_vm0, %v968_v25, 0.0 }
 0x129   : > { %v991_v28 = vpop.xlane.xlu2 %990  ;;  %v985_v29 = vpop.xlane.xlu1 %984 }
 0x12a   : > { %v979_v32 = vpop.xlane.xlu0 %978  ;;  %v1171_v46 = vmul.f32 0.015625, %v985_v29  ;;  %v1173_v55 = vmul.f32 0.015625, %v991_v28 }
 0x12b   : > { %v1169_v39 = vmul.f32 0.015625, %v979_v32  ;;  %v966_v32 = vld [vmem:[%s2917_s17 + $0x1b0] sm:$0xff] }
 0x12c   : > { %v1625_v60 = vperm.slane %v1171_v46, %v3027_v45  ;;  %v1633_v63 = vperm.slane %v1173_v55, %v3035_v54 }
 0x12d   : > { %v1619_v57 = vperm.slane %v1169_v39, %v3015_v36  ;;  %v1142_v39 = vsel %vm976_vm0, %v967_v26, 0.0 }
 0x12e   : > { %1119 = vadd.xlane.f32.xlu2 %v1118_v33  ;;  %1116 = vadd.xlane.f32.xlu1 %v1115_v34 }
 0x12f   : > { %1113 = vadd.xlane.f32.xlu0 %v1112_v35 }
 0x131   : > { %v994_v40 = vpop.xlane.xlu2 %993  ;;  %v988_v42 = vpop.xlane.xlu1 %987 }
 0x132   : > { %v1172_v48 = vmul.f32 0.015625, %v988_v42  ;;  %v982_v49 = vpop.xlane.xlu0 %981  ;;  %v1174_v50 = vmul.f32 0.015625, %v994_v40  ;;  %v1139_v42 = vsel %vm976_vm0, %v966_v32, 0.0 }
 0x133   : > { %v1170_v51 = vmul.f32 0.015625, %v982_v49 }
 0x134   : > { %v1629_v58 = vperm.slane %v1172_v48, %v3020_v41  ;;  %v1637_v61 = vperm.slane %v1174_v50, %v3030_v47  ;;  %v3091_v50 = vadd.s32 4294967192, %v3015_v36 }
 0x135   : > { %v1621_v59 = vperm.slane %v1170_v51, %v3023_v43  ;;  %v971_v51 = vld [vmem:[%s2917_s17 + $0x1d8] sm:$0xff] }
 0x136   : > { %1128 = vadd.xlane.f32.xlu2 %v1127_v52  ;;  %1125 = vadd.xlane.f32.xlu1 %v1124_v53  ;;  %v970_v52 = vld [vmem:[%s2917_s17 + $0x1d0] sm:$0xff]  ;;  %v3096_v53 = vadd.s32 4294967184, %v3015_v36 }
 0x137   : > { %v1623_v62 = vsel %vm1622_vm1, %v1621_v59, %v1619_v57  ;;  %1122 = vadd.xlane.f32.xlu0 %v1121_v56  ;;  %v969_v59 = vld [vmem:[%s2917_s17 + $0x1c8] sm:$0xff]  ;;  %v1151_v2 = vsel %vm976_vm0, %v970_v52, 0.0 }
 0x138   : > { %v1627_v0 = vsel %vm1626_vm2, %v1625_v60, %v1623_v62 }
 0x139   : > { %v1631_v4 = vsel %vm1630_vm3, %v1629_v58, %v1627_v0  ;;  %v1003_v6 = vpop.xlane.xlu2 %1002  ;;  %v1000_v7 = vpop.xlane.xlu1 %999  ;;  %v3100_v58 = vadd.s32 4294967200, %v3015_v36  ;;  %v1154_v0 = vsel %vm976_vm0, %v971_v51, 0.0 }
 0x13a   : > { %v1177_v10 = vmul.f32 0.015625, %v1003_v6  ;;  %v1176_v11 = vmul.f32 0.015625, %v1000_v7  ;;  %v1635_v12 = vsel %vm1634_vm4, %v1633_v63, %v1631_v4  ;;  %v997_v13 = vpop.xlane.xlu0 %996  ;;  %v1148_v4 = vsel %vm976_vm0, %v969_v59, 0.0  ;;  %v1237_v59 = vld [vmem:[%s3129_s18 + $0x20] sm:$0xff] }
 0x13b   : > { %v1639_v14 = vsel %vm1638_vm5, %v1637_v61, %v1635_v12  ;;  %v1175_v15 = vmul.f32 0.015625, %v997_v13  ;;  %v973_v12 = vld [vmem:[%s2917_s17 + $0x1e8] sm:$0xff] }
 0x13c   : > { %v1645_v18 = vperm.slane %v1176_v11, %v3047_v1  ;;  %v1649_v20 = vperm.slane %v1177_v10, %v3053_v5  ;;  %v974_v11 = vld [vmem:[%s2917_s17 + $0x1f0] sm:$0xff] }
 0x13d   : > { %v1641_v21 = vperm.slane %v1175_v15, %v3056_v8 }
 0x13e   : > { %1137 = vadd.xlane.f32.xlu2 %v1136_v16  ;;  %1134 = vadd.xlane.f32.xlu1 %v1133_v17  ;;  %v3115_v16 = vadd.s32 4294967176, %v3015_v36  ;;  %v972_v17 = vld [vmem:[%s2917_s17 + $0x1e0] sm:$0xff] }
 0x13f   : > { %v1643_v22 = vsel %vm1642_vm6, %v1641_v21, %v1639_v14  ;;  %1131 = vadd.xlane.f32.xlu0 %v1130_v19 }
 0x140   : > { %v1647_v23 = vsel %vm1646_vm7, %v1645_v18, %v1643_v22  ;;  %v1163_v22 = vsel %vm976_vm0, %v974_v11, 0.0 }
 0x141   : > { %v1012_v28 = vpop.xlane.xlu2 %1011  ;;  %v1009_v29 = vpop.xlane.xlu1 %1008  ;;  %v1651_v30 = vsel %vm1650_vm8, %v1649_v20, %v1647_v23  ;;  %v1160_v23 = vsel %vm976_vm0, %v973_v12, 0.0 }
 0x142   : > { %v1180_v33 = vmul.f32 0.015625, %v1012_v28  ;;  %v1179_v34 = vmul.f32 0.015625, %v1009_v29  ;;  %v1006_v35 = vpop.xlane.xlu0 %1005  ;;  %v1157_v28 = vsel %vm976_vm0, %v972_v17, 0.0  ;;  %v1240_v17 = vld [vmem:[%s3129_s18 + $0x38] sm:$0xff] }
 0x143   : > { %v1178_v37 = vmul.f32 0.015625, %v1006_v35 }
 0x144   : > { %v1657_v40 = vperm.slane %v1179_v34, %v3070_v24  ;;  %v1661_v44 = vperm.slane %v1180_v33, %v3075_v27  ;;  %v1234_v33 = vld [vmem:[%s3129_s18 + $0x8] sm:$0xff]  ;;  %v1233_v34 = vld [vmem:[%s3129_s18] sm:$0xff] }
 0x145   : > { %v1653_v46 = vperm.slane %v1178_v37, %v3079_v31 }
 0x146   : > { %1146 = vadd.xlane.f32.xlu2 %v1145_v38  ;;  %1143 = vadd.xlane.f32.xlu1 %v1142_v39  ;;  %v975_v38 = vld [vmem:[%s2917_s17 + $0x1f8] sm:$0xff] }
 0x147   : > { %v1655_v48 = vsel %vm1654_vm9, %v1653_v46, %v1651_v30  ;;  %1140 = vadd.xlane.f32.xlu0 %v1139_v42  ;;  %v1300_v46 = vsel %vm976_vm0, %v1234_v33, 0.0  ;;  %v1166_v51 = vsel %vm976_vm0, %v975_v38, 0.0 }
 0x148   : > { %v1659_v49 = vsel %vm1658_vm10, %v1657_v40, %v1655_v48  ;;  %v1297_v48 = vsel %vm976_vm0, %v1233_v34, 0.0 }
 0x149   : > { %v1021_v55 = vpop.xlane.xlu2 %1020  ;;  %v1018_v56 = vpop.xlane.xlu1 %1017  ;;  %v1663_v57 = vsel %vm3634_vm11, %v1661_v44, %v1659_v49 }
 0x14a   : > { %v1183_v60 = vmul.f32 0.015625, %v1021_v55  ;;  %v1182_v61 = vmul.f32 0.015625, %v1018_v56  ;;  %v1015_v62 = vpop.xlane.xlu0 %1014 }
 0x14b   : > { %v1181_v63 = vmul.f32 0.015625, %v1015_v62 }
 0x14c   : > { %v1669_v3 = vperm.slane %v1182_v61, %v3091_v50  ;;  %v1673_v6 = vperm.slane %v1183_v60, %v3096_v53  ;;  %v1236_v60 = vld [vmem:[%s3129_s18 + $0x18] sm:$0xff] }
 0x14d   : > { %v1665_v7 = vperm.slane %v1181_v63, %v3100_v58 }
 0x14e   : > { %1155 = vadd.xlane.f32.xlu2 %v1154_v0  ;;  %1152 = vadd.xlane.f32.xlu1 %v1151_v2  ;;  %v1235_v0 = vld [vmem:[%s3129_s18 + $0x10] sm:$0xff] }
 0x14f   : > { %v1667_v9 = vsel %vm3632_vm12, %v1665_v7, %v1663_v57  ;;  %1149 = vadd.xlane.f32.xlu0 %v1148_v4  ;;  %v1309_v7 = vsel %vm976_vm0, %v1237_v59, 0.0  ;;  %v1303_v11 = vsel %vm976_vm0, %v1235_v0, 0.0 }
 0x150   : > { %v1671_v10 = vsel %vm1670_vm13, %v1669_v3, %v1667_v9  ;;  %v1306_v9 = vsel %vm976_vm0, %v1236_v60, 0.0 }
 0x151   : > { %v1030_v13 = vpop.xlane.xlu2 %1029  ;;  %v1027_v14 = vpop.xlane.xlu1 %1026  ;;  %v1675_v15 = vsel %vm1674_vm14, %v1673_v6, %v1671_v10 }
 0x152   : > { %v1186_v18 = vmul.f32 0.015625, %v1030_v13  ;;  %v1185_v19 = vmul.f32 0.015625, %v1027_v14  ;;  %v1024_v20 = vpop.xlane.xlu0 %1023 }
 0x153   : > { %v1184_v21 = vmul.f32 0.015625, %v1024_v20 }
 0x154   : > { %v1681_v25 = vperm.slane %v1186_v18, %v3023_v43  ;;  %v1680_v26 = vperm.slane %v1185_v19, %v3015_v36  ;;  %v1239_v18 = vld [vmem:[%s3129_s18 + $0x30] sm:$0xff] }
 0x155   : > { %v1677_v29 = vperm.slane %v1184_v21, %v3115_v16 }
 0x156   : > { %v1682_v30 = vsel %vm1622_vm1, %v1681_v25, %v1680_v26  ;;  %1164 = vadd.xlane.f32.xlu2 %v1163_v22  ;;  %1161 = vadd.xlane.f32.xlu1 %v1160_v23  ;;  %v1238_v22 = vld [vmem:[%s3129_s18 + $0x28] sm:$0xff] }
 0x157   : > { %v3126_v32 = vsel %vm1678_vm15, %v1677_v29, %v1675_v15  ;;  %1158 = vadd.xlane.f32.xlu0 %v1157_v28  ;;  %v1318_v29 = vsel %vm976_vm0, %v1240_v17, 0.0  ;;  %v1312_v34 = vsel %vm976_vm0, %v1238_v22, 0.0 }
 0x159   : > { %v1039_v35 = vpop.xlane.xlu2 %1038  ;;  %v1036_v37 = vpop.xlane.xlu1 %1035 }
 0x15a   : > { %v1189_v39 = vmul.f32 0.015625, %v1039_v35  ;;  %v1188_v40 = vmul.f32 0.015625, %v1036_v37  ;;  %v1033_v42 = vpop.xlane.xlu0 %1032 }
 0x15b   : > { %v1187_v44 = vmul.f32 0.015625, %v1033_v42  ;;  %v1242_v42 = vld [vmem:[%s3129_s18 + $0x48] sm:$0xff] }
 0x15c   : > { %v1685_v49 = vperm.slane %v1188_v40, %v3020_v41  ;;  %v1687_v52 = vperm.slane %v1189_v39, %v3035_v54  ;;  %v1243_v40 = vld [vmem:[%s3129_s18 + $0x50] sm:$0xff]  ;;  %v1324_v59 = vsel %vm976_vm0, %v1242_v42, 0.0 }
 0x15d   : > { %v1683_v55 = vperm.slane %v1187_v44, %v3027_v45 }
 0x15e   : > { %1301 = vadd.xlane.f32.xlu2 %v1300_v46  ;;  %1298 = vadd.xlane.f32.xlu1 %v1297_v48 }
 0x15f   : > { %v1684_v56 = vsel %vm1626_vm2, %v1683_v55, %v1682_v30  ;;  %1167 = vadd.xlane.f32.xlu0 %v1166_v51  ;;  %v1315_v30 = vsel %vm976_vm0, %v1239_v18, 0.0 }
 0x160   : > { %v1686_v57 = vsel %vm1630_vm3, %v1685_v49, %v1684_v56  ;;  %v1241_v49 = vld [vmem:[%s3129_s18 + $0x40] sm:$0xff] }
 0x161   : > { %v1048_v61 = vpop.xlane.xlu2 %1047  ;;  %v1045_v62 = vpop.xlane.xlu1 %1044  ;;  %v1688_v63 = vsel %vm1634_vm4, %v1687_v52, %v1686_v57  ;;  %v1327_v57 = vsel %vm976_vm0, %v1243_v40, 0.0 }
 0x162   : > { %v1192_v2 = vmul.f32 0.015625, %v1048_v61  ;;  %v1191_v3 = vmul.f32 0.015625, %v1045_v62  ;;  %v1042_v4 = vpop.xlane.xlu0 %1041  ;;  %v1321_v61 = vsel %vm976_vm0, %v1241_v49, 0.0  ;;  %v1251_v49 = vld [vmem:[%s3129_s18 + $0x90] sm:$0xff] }
 0x163   : > { %v1190_v6 = vmul.f32 0.015625, %v1042_v4  ;;  %v1245_v4 = vld [vmem:[%s3129_s18 + $0x60] sm:$0xff] }
 0x164   : > { %v1691_v10 = vperm.slane %v1191_v3, %v3056_v8  ;;  %v1693_v12 = vperm.slane %v1192_v2, %v3047_v1  ;;  %v1246_v3 = vld [vmem:[%s3129_s18 + $0x68] sm:$0xff] }
 0x165   : > { %v1689_v13 = vperm.slane %v1190_v6, %v3030_v47 }
 0x166   : > { %1310 = vadd.xlane.f32.xlu2 %v1309_v7  ;;  %1307 = vadd.xlane.f32.xlu1 %v1306_v9 }
 0x167   : > { %v1690_v14 = vsel %vm1638_vm5, %v1689_v13, %v1688_v63  ;;  %1304 = vadd.xlane.f32.xlu0 %v1303_v11 }
 0x168   : > { %v1692_v15 = vsel %vm1642_vm6, %v1691_v10, %v1690_v14  ;;  %v1244_v10 = vld [vmem:[%s3129_s18 + $0x58] sm:$0xff]  ;;  %v1336_v14 = vsel %vm976_vm0, %v1246_v3, 0.0 }
 0x169   : > { %v1057_v19 = vpop.xlane.xlu2 %1056  ;;  %v1054_v20 = vpop.xlane.xlu1 %1053  ;;  %v1694_v21 = vsel %vm1646_vm7, %v1693_v12, %v1692_v15  ;;  %v1333_v15 = vsel %vm976_vm0, %v1245_v4, 0.0  ;;  %v1330_v18 = vsel %vm976_vm0, %v1244_v10, 0.0  ;;  %v1255_v4 = vld [vmem:[%s3129_s18 + $0xb0] sm:$0xff] }
 0x16a   : > { %v1195_v23 = vmul.f32 0.015625, %v1057_v19  ;;  %v1194_v25 = vmul.f32 0.015625, %v1054_v20  ;;  %v1051_v26 = vpop.xlane.xlu0 %1050 }
 0x16b   : > { %v1193_v28 = vmul.f32 0.015625, %v1051_v26 }
 0x16c   : > { %v1697_v33 = vperm.slane %v1194_v25, %v3079_v31  ;;  %v1699_v35 = vperm.slane %v1195_v23, %v3070_v24  ;;  %v1249_v23 = vld [vmem:[%s3129_s18 + $0x80] sm:$0xff]  ;;  %v1248_v25 = vld [vmem:[%s3129_s18 + $0x78] sm:$0xff] }
 0x16d   : > { %v1695_v37 = vperm.slane %v1193_v28, %v3053_v5 }
 0x16e   : > { %1319 = vadd.xlane.f32.xlu2 %v1318_v29  ;;  %1316 = vadd.xlane.f32.xlu1 %v1315_v30  ;;  %v1247_v30 = vld [vmem:[%s3129_s18 + $0x70] sm:$0xff] }
 0x16f   : > { %v1696_v38 = vsel %vm1650_vm8, %v1695_v37, %v1694_v21  ;;  %1313 = vadd.xlane.f32.xlu0 %v1312_v34 }
 0x170   : > { %v1698_v39 = vsel %vm1654_vm9, %v1697_v33, %v1696_v38  ;;  %v1345_v38 = vsel %vm976_vm0, %v1249_v23, 0.0 }
 0x171   : > { %v1066_v44 = vpop.xlane.xlu2 %1065  ;;  %v1063_v46 = vpop.xlane.xlu1 %1062  ;;  %v1700_v48 = vsel %vm1658_vm10, %v1699_v35, %v1698_v39  ;;  %v1342_v39 = vsel %vm976_vm0, %v1248_v25, 0.0 }
 0x172   : > { %v1198_v51 = vmul.f32 0.015625, %v1066_v44  ;;  %v1197_v52 = vmul.f32 0.015625, %v1063_v46  ;;  %v1060_v55 = vpop.xlane.xlu0 %1059 }
 0x173   : > { %v1196_v56 = vmul.f32 0.015625, %v1060_v55 }
 0x174   : > { %v1703_v60 = vperm.slane %v1197_v52, %v3100_v58  ;;  %v1705_v62 = vperm.slane %v1198_v51, %v3091_v50 }
 0x175   : > { %v1701_v63 = vperm.slane %v1196_v56, %v3075_v27  ;;  %v1250_v56 = vld [vmem:[%s3129_s18 + $0x88] sm:$0xff] }
 0x176   : > { %1328 = vadd.xlane.f32.xlu2 %v1327_v57  ;;  %1325 = vadd.xlane.f32.xlu1 %v1324_v59 }
 0x177   : > { %v1702_v0 = vsel %vm3634_vm11, %v1701_v63, %v1700_v48  ;;  %1322 = vadd.xlane.f32.xlu0 %v1321_v61  ;;  %v1252_v48 = vld [vmem:[%s3129_s18 + $0x98] sm:$0xff]  ;;  %v1351_v61 = vsel %vm976_vm0, %v1251_v49, 0.0 }
 0x178   : > { %v1704_v2 = vsel %vm3632_vm12, %v1703_v60, %v1702_v0  ;;  %vm3633_vm12 = vcmask 1041409   ;;  %v1354_v60 = vsel %vm976_vm0, %v1252_v48, 0.0 }
 0x179   : > { %v1075_v6 = vpop.xlane.xlu2 %1074  ;;  %v1072_v7 = vpop.xlane.xlu1 %1071  ;;  %v1706_v9 = vsel %vm1670_vm13, %v1705_v62, %v1704_v2  ;;  %v1348_v62 = vsel %vm976_vm0, %v1250_v56, 0.0 }
 0x17a   : > { %v1200_v11 = vmul.f32 0.015625, %v1072_v7  ;;  %v1069_v12 = vpop.xlane.xlu0 %1068  ;;  %v1201_v20 = vmul.f32 0.015625, %v1075_v6  ;;  %v1254_v6 = vld [vmem:[%s3129_s18 + $0xa8] sm:$0xff] }
 0x17b   : > { %v1199_v13 = vmul.f32 0.015625, %v1069_v12  ;;  %v1253_v12 = vld [vmem:[%s3129_s18 + $0xa0] sm:$0xff] }
 0x17c   : > { %v1709_v17 = vperm.slane %v1200_v11, %v3115_v16  ;;  %v1711_v35 = vperm.slane %v1201_v20, %v3015_v36 }
 0x17d   : > { %v1707_v19 = vperm.slane %v1199_v13, %v3096_v53 }
 0x17e   : > { %1337 = vadd.xlane.f32.xlu2 %v1336_v14  ;;  %1334 = vadd.xlane.f32.xlu1 %v1333_v15 }
 0x17f   : > { %v1708_v21 = vsel %vm1674_vm14, %v1707_v19, %v1706_v9  ;;  %1331 = vadd.xlane.f32.xlu0 %v1330_v18  ;;  %v1360_v18 = vsel %vm976_vm0, %v1254_v6, 0.0 }
 0x180   : > { %v1710_v22 = vsel %vm1678_vm15, %v1709_v17, %v1708_v21  ;;  %v1363_v17 = vsel %vm976_vm0, %v1255_v4, 0.0  ;;  %v1357_v21 = vsel %vm976_vm0, %v1253_v12, 0.0 }
 0x181   : > { %v3193_v26 = vsel %vm3633_vm12, %v1710_v22, %v3126_v32  ;;  %v1084_v28 = vpop.xlane.xlu2 %1083  ;;  %v1081_v29 = vpop.xlane.xlu1 %1080  ;;  %v1339_v32 = vsel %vm976_vm0, %v1247_v30, 0.0  ;;  %vm3647_vm12 = vcmask 851712  }
 0x182   : > { %v1203_v33 = vmul.f32 0.015625, %v1081_v29  ;;  %v1078_v34 = vpop.xlane.xlu0 %1077  ;;  %v1204_v51 = vmul.f32 0.015625, %v1084_v28  ;;  %v1258_v28 = vld [vmem:[%s3129_s18 + $0xc8] sm:$0xff] }
 0x183   : > { %v1202_v37 = vmul.f32 0.015625, %v1078_v34 }
 0x184   : > { %v1714_v40 = vperm.slane %v1203_v33, %v3027_v45  ;;  %v1716_v63 = vperm.slane %v1204_v51, %v3020_v41  ;;  %v1257_v33 = vld [vmem:[%s3129_s18 + $0xc0] sm:$0xff] }
 0x185   : > { %v1712_v42 = vperm.slane %v1202_v37, %v3023_v43 }
 0x186   : > { %1346 = vadd.xlane.f32.xlu2 %v1345_v38  ;;  %1343 = vadd.xlane.f32.xlu1 %v1342_v39  ;;  %v1256_v38 = vld [vmem:[%s3129_s18 + $0xb8] sm:$0xff] }
 0x187   : > { %v1713_v44 = vsel %vm1622_vm1, %v1712_v42, %v1711_v35  ;;  %1340 = vadd.xlane.f32.xlu0 %v1339_v32  ;;  %v1366_v49 = vsel %vm976_vm0, %v1256_v38, 0.0  ;;  %v1267_v38 = vld [vmem:[%s3129_s18 + $0x110] sm:$0xff] }
 0x188   : > { %v1715_v46 = vsel %vm1626_vm2, %v1714_v40, %v1713_v44  ;;  %v1372_v40 = vsel %vm976_vm0, %v1258_v28, 0.0 }
 0x189   : > { %v1093_v52 = vpop.xlane.xlu2 %1092  ;;  %v1090_v55 = vpop.xlane.xlu1 %1089  ;;  %v1717_v9 = vsel %vm1630_vm3, %v1716_v63, %v1715_v46  ;;  %v1369_v46 = vsel %vm976_vm0, %v1257_v33, 0.0  ;;  %v1259_v63 = vld [vmem:[%s3129_s18 + $0xd0] sm:$0xff] }
 0x18a   : > { %v1087_v57 = vpop.xlane.xlu0 %1086  ;;  %v1206_v0 = vmul.f32 0.015625, %v1090_v55  ;;  %v1207_v3 = vmul.f32 0.015625, %v1093_v52  ;;  %v1375_v12 = vsel %vm976_vm0, %v1259_v63, 0.0 }
 0x18b   : > { %v1205_v59 = vmul.f32 0.015625, %v1087_v57 }
 0x18c   : > { %v1720_v7 = vperm.slane %v1206_v0, %v3030_v47  ;;  %v1722_v19 = vperm.slane %v1207_v3, %v3056_v8 }
 0x18d   : > { %v1718_v2 = vperm.slane %v1205_v59, %v3035_v54  ;;  %v1261_v59 = vld [vmem:[%s3129_s18 + $0xe0] sm:$0xff] }
 0x18e   : > { %1355 = vadd.xlane.f32.xlu2 %v1354_v60  ;;  %1352 = vadd.xlane.f32.xlu1 %v1351_v61  ;;  %v1260_v60 = vld [vmem:[%s3129_s18 + $0xd8] sm:$0xff] }
 0x18f   : > { %1349 = vadd.xlane.f32.xlu0 %v1348_v62  ;;  %v1719_v13 = vsel %vm1634_vm4, %v1718_v2, %v1717_v9  ;;  %v1381_v9 = vsel %vm976_vm0, %v1261_v59, 0.0 }
 0x190   : > { %v1721_v22 = vsel %vm1638_vm5, %v1720_v7, %v1719_v13 }
 0x191   : > { %v1102_v10 = vpop.xlane.xlu2 %1101  ;;  %v1099_v11 = vpop.xlane.xlu1 %1098  ;;  %v1723_v30 = vsel %vm1642_vm6, %v1722_v19, %v1721_v22  ;;  %v1264_v19 = vld [vmem:[%s3129_s18 + $0xf8] sm:$0xff] }
 0x192   : > { %v1096_v14 = vpop.xlane.xlu0 %1095  ;;  %v1209_v20 = vmul.f32 0.015625, %v1099_v11  ;;  %v1210_v25 = vmul.f32 0.015625, %v1102_v10  ;;  %v1378_v10 = vsel %vm976_vm0, %v1260_v60, 0.0 }
 0x193   : > { %v1208_v15 = vmul.f32 0.015625, %v1096_v14 }
 0x194   : > { %v1726_v29 = vperm.slane %v1209_v20, %v3053_v5  ;;  %v1728_v32 = vperm.slane %v1210_v25, %v3079_v31  ;;  %v1263_v20 = vld [vmem:[%s3129_s18 + $0xf0] sm:$0xff]  ;;  %v1262_v25 = vld [vmem:[%s3129_s18 + $0xe8] sm:$0xff] }
 0x195   : > { %v1724_v23 = vperm.slane %v1208_v15, %v3047_v1  ;;  %v1387_v33 = vsel %vm976_vm0, %v1263_v20, 0.0  ;;  %v1273_v20 = vld [vmem:[%s3129_s18 + $0x140] sm:$0xff] }
 0x196   : > { %1364 = vadd.xlane.f32.xlu2 %v1363_v17  ;;  %1361 = vadd.xlane.f32.xlu1 %v1360_v18 }
 0x197   : > { %1358 = vadd.xlane.f32.xlu0 %v1357_v21  ;;  %v1725_v34 = vsel %vm1646_vm7, %v1724_v23, %v1723_v30  ;;  %v1390_v30 = vsel %vm976_vm0, %v1264_v19, 0.0 }
 0x198   : > { %v1727_v48 = vsel %vm1650_vm8, %v1726_v29, %v1725_v34  ;;  %v1384_v34 = vsel %vm976_vm0, %v1262_v25, 0.0 }
 0x199   : > { %v1111_v35 = vpop.xlane.xlu2 %1110  ;;  %v1108_v37 = vpop.xlane.xlu1 %1107  ;;  %v1729_v56 = vsel %vm1654_vm9, %v1728_v32, %v1727_v48 }
 0x19a   : > { %v1105_v39 = vpop.xlane.xlu0 %1104  ;;  %v1212_v42 = vmul.f32 0.015625, %v1108_v37  ;;  %v1213_v52 = vmul.f32 0.015625, %v1111_v35 }
 0x19b   : > { %v1211_v44 = vmul.f32 0.015625, %v1105_v39  ;;  %v1266_v39 = vld [vmem:[%s3129_s18 + $0x108] sm:$0xff] }
 0x19c   : > { %v1732_v55 = vperm.slane %v1212_v42, %v3075_v27  ;;  %v1734_v0 = vperm.slane %v1213_v52, %v3100_v58  ;;  %v1265_v42 = vld [vmem:[%s3129_s18 + $0x100] sm:$0xff]  ;;  %v1396_v52 = vsel %vm976_vm0, %v1266_v39, 0.0 }
 0x19d   : > { %v1730_v51 = vperm.slane %v1211_v44, %v3070_v24 }
 0x19e   : > { %1373 = vadd.xlane.f32.xlu2 %v1372_v40  ;;  %1370 = vadd.xlane.f32.xlu1 %v1369_v46  ;;  %v1399_v46 = vsel %vm976_vm0, %v1267_v38, 0.0 }
 0x19f   : > { %1367 = vadd.xlane.f32.xlu0 %v1366_v49  ;;  %v1731_v57 = vsel %vm1658_vm10, %v1730_v51, %v1729_v56 }
 0x1a0   : > { %v1733_v6 = vsel %vm3634_vm11, %v1732_v55, %v1731_v57  ;;  %vm3635_vm11 = vcmask 1042434   ;;  %v1393_v55 = vsel %vm976_vm0, %v1265_v42, 0.0 }
 0x1a1   : > { %v1120_v61 = vpop.xlane.xlu2 %1119  ;;  %v1117_v62 = vpop.xlane.xlu1 %1116  ;;  %v1735_v15 = vsel %vm3647_vm12, %v1734_v0, %v1733_v6  ;;  %vm3648_vm12 = vcmask 786112  }
 0x1a2   : > { %v1216_v2 = vmul.f32 0.015625, %v1120_v61  ;;  %v1215_v3 = vmul.f32 0.015625, %v1117_v62  ;;  %v1114_v4 = vpop.xlane.xlu0 %1113  ;;  %v1270_v61 = vld [vmem:[%s3129_s18 + $0x128] sm:$0xff]  ;;  %v1269_v62 = vld [vmem:[%s3129_s18 + $0x120] sm:$0xff] }
 0x1a3   : > { %v1214_v7 = vmul.f32 0.015625, %v1114_v4 }
 0x1a4   : > { %v1738_v11 = vperm.slane %v1215_v3, %v3096_v53  ;;  %v1740_v13 = vperm.slane %v1216_v2, %v3115_v16  ;;  %v1268_v3 = vld [vmem:[%s3129_s18 + $0x118] sm:$0xff] }
 0x1a5   : > { %v1736_v14 = vperm.slane %v1214_v7, %v3091_v50 }
 0x1a6   : > { %1382 = vadd.xlane.f32.xlu2 %v1381_v9  ;;  %1379 = vadd.xlane.f32.xlu1 %v1378_v10 }
 0x1a7   : > { %v1737_v17 = vsel %vm1670_vm13, %v1736_v14, %v1735_v15  ;;  %1376 = vadd.xlane.f32.xlu0 %v1375_v12  ;;  %v1405_v12 = vsel %vm976_vm0, %v1269_v62, 0.0 }
 0x1a8   : > { %v1739_v18 = vsel %vm1674_vm14, %v1738_v11, %v1737_v17  ;;  %v1408_v11 = vsel %vm976_vm0, %v1270_v61, 0.0 }
 0x1a9   : > { %v1741_v21 = vsel %vm1678_vm15, %v1740_v13, %v1739_v18  ;;  %v1129_v22 = vpop.xlane.xlu2 %1128  ;;  %v1126_v23 = vpop.xlane.xlu1 %1125  ;;  %v1402_v13 = vsel %vm976_vm0, %v1268_v3, 0.0 }
 0x1aa   : > { %v1123_v28 = vpop.xlane.xlu0 %1122  ;;  %v3259_v29 = vsel %vm3635_vm11, %v1741_v21, %v3193_v26  ;;  %v1218_v35 = vmul.f32 0.015625, %v1126_v23  ;;  %v1219_v44 = vmul.f32 0.015625, %v1129_v22  ;;  %v1272_v21 = vld [vmem:[%s3129_s18 + $0x138] sm:$0xff]  ;;  %vm3649_vm11 = vcmask 851712  }
 0x1ab   : > { %v1217_v37 = vmul.f32 0.015625, %v1123_v28  ;;  %v1414_v38 = vsel %vm976_vm0, %v1272_v21, 0.0 }
 0x1ac   : > { %v1743_v48 = vperm.slane %v1218_v35, %v3023_v43  ;;  %v1745_v56 = vperm.slane %v1219_v44, %v3027_v45 }
 0x1ad   : > { %v1742_v49 = vperm.slane %v1217_v37, %v3015_v36  ;;  %v1417_v37 = vsel %vm976_vm0, %v1273_v20, 0.0 }
 0x1ae   : > { %1391 = vadd.xlane.f32.xlu2 %v1390_v30  ;;  %1388 = vadd.xlane.f32.xlu1 %v1387_v33  ;;  %v1271_v30 = vld [vmem:[%s3129_s18 + $0x130] sm:$0xff] }
 0x1af   : > { %1385 = vadd.xlane.f32.xlu0 %v1384_v34  ;;  %v1744_v59 = vsel %vm1622_vm1, %v1743_v48, %v1742_v49 }
 0x1b0   : > { %v1746_v6 = vsel %vm1626_vm2, %v1745_v56, %v1744_v59 }
 0x1b1   : > { %v1138_v40 = vpop.xlane.xlu2 %1137  ;;  %v1135_v32 = vpop.xlane.xlu1 %1134 }
 0x1b2   : > { %v1132_v26 = vpop.xlane.xlu0 %1131  ;;  %v1221_v57 = vmul.f32 0.015625, %v1135_v32  ;;  %v1222_v63 = vmul.f32 0.015625, %v1138_v40  ;;  %v1411_v32 = vsel %vm976_vm0, %v1271_v30, 0.0 }
 0x1b3   : > { %v1220_v51 = vmul.f32 0.015625, %v1132_v26 }
 0x1b4   : > { %v1749_v4 = vperm.slane %v1221_v57, %v3035_v54  ;;  %v1751_v14 = vperm.slane %v1222_v63, %v3030_v47  ;;  %v1274_v57 = vld [vmem:[%s3129_s18 + $0x148] sm:$0xff] }
 0x1b5   : > { %v1747_v60 = vperm.slane %v1220_v51, %v3020_v41  ;;  %v1275_v51 = vld [vmem:[%s3129_s18 + $0x150] sm:$0xff]  ;;  %v1420_v3 = vsel %vm976_vm0, %v1274_v57, 0.0 }
 0x1b6   : > { %1400 = vadd.xlane.f32.xlu2 %v1399_v46  ;;  %1397 = vadd.xlane.f32.xlu1 %v1396_v52  ;;  %v1276_v46 = vld [vmem:[%s3129_s18 + $0x158] sm:$0xff] }
 0x1b7   : > { %1394 = vadd.xlane.f32.xlu0 %v1393_v55  ;;  %v1748_v9 = vsel %vm1630_vm3, %v1747_v60, %v1746_v6  ;;  %v1426_v60 = vsel %vm976_vm0, %v1276_v46, 0.0 }
 0x1b8   : > { %v1750_v17 = vsel %vm1634_vm4, %v1749_v4, %v1748_v9 }
 0x1b9   : > { %v1147_v0 = vpop.xlane.xlu2 %1146  ;;  %v1144_v2 = vpop.xlane.xlu1 %1143  ;;  %v1752_v23 = vsel %vm1638_vm5, %v1751_v14, %v1750_v17 }
 0x1ba   : > { %v1141_v7 = vpop.xlane.xlu0 %1140  ;;  %v1224_v15 = vmul.f32 0.015625, %v1144_v2  ;;  %v1225_v19 = vmul.f32 0.015625, %v1147_v0  ;;  %v1423_v0 = vsel %vm976_vm0, %v1275_v51, 0.0 }
 0x1bb   : > { %v1223_v10 = vmul.f32 0.015625, %v1141_v7 }
 0x1bc   : > { %v1755_v22 = vperm.slane %v1224_v15, %v3047_v1  ;;  %v1757_v39 = vperm.slane %v1225_v19, %v3053_v5  ;;  %v1281_v15 = vld [vmem:[%s3129_s18 + $0x180] sm:$0xff] }
 0x1bd   : > { %v1753_v18 = vperm.slane %v1223_v10, %v3056_v8 }
 0x1be   : > { %1409 = vadd.xlane.f32.xlu2 %v1408_v11  ;;  %1406 = vadd.xlane.f32.xlu1 %v1405_v12  ;;  %v1283_v11 = vld [vmem:[%s3129_s18 + $0x190] sm:$0xff]  ;;  %v1282_v12 = vld [vmem:[%s3129_s18 + $0x188] sm:$0xff] }
 0x1bf   : > { %1403 = vadd.xlane.f32.xlu0 %v1402_v13  ;;  %v1754_v33 = vsel %vm1642_vm6, %v1753_v18, %v1752_v23  ;;  %v1447_v23 = vsel %vm976_vm0, %v1283_v11, 0.0 }
 0x1c0   : > { %v1756_v42 = vsel %vm1646_vm7, %v1755_v22, %v1754_v33  ;;  %v1441_v33 = vsel %vm976_vm0, %v1281_v15, 0.0 }
 0x1c1   : > { %v1156_v25 = vpop.xlane.xlu2 %1155  ;;  %v1153_v28 = vpop.xlane.xlu1 %1152  ;;  %v1758_v49 = vsel %vm1650_vm8, %v1757_v39, %v1756_v42 }
 0x1c2   : > { %v1150_v34 = vpop.xlane.xlu0 %1149  ;;  %v1227_v40 = vmul.f32 0.015625, %v1153_v28  ;;  %v1228_v26 = vmul.f32 0.015625, %v1156_v25  ;;  %v1444_v25 = vsel %vm976_vm0, %v1282_v12, 0.0 }
 0x1c3   : > { %v1226_v35 = vmul.f32 0.015625, %v1150_v34 }
 0x1c4   : > { %v1761_v48 = vperm.slane %v1227_v40, %v3070_v24  ;;  %v1763_v61 = vperm.slane %v1228_v26, %v3075_v27  ;;  %v1286_v40 = vld [vmem:[%s3129_s18 + $0x1a8] sm:$0xff]  ;;  %v1284_v26 = vld [vmem:[%s3129_s18 + $0x198] sm:$0xff] }
 0x1c5   : > { %v1759_v44 = vperm.slane %v1226_v35, %v3079_v31 }
 0x1c6   : > { %1418 = vadd.xlane.f32.xlu2 %v1417_v37  ;;  %1415 = vadd.xlane.f32.xlu1 %v1414_v38 }
 0x1c7   : > { %1412 = vadd.xlane.f32.xlu0 %v1411_v32  ;;  %v1760_v52 = vsel %vm1654_vm9, %v1759_v44, %v1758_v49  ;;  %v1285_v32 = vld [vmem:[%s3129_s18 + $0x1a0] sm:$0xff] }
 0x1c8   : > { %v1762_v2 = vsel %vm1658_vm10, %v1761_v48, %v1760_v52  ;;  %v1456_v52 = vsel %vm976_vm0, %v1286_v40, 0.0 }
 0x1c9   : > { %v1165_v55 = vpop.xlane.xlu2 %1164  ;;  %v1162_v56 = vpop.xlane.xlu1 %1161  ;;  %v1764_v9 = vsel %vm3648_vm12, %v1763_v61, %v1762_v2 }
 0x1ca   : > { %v1159_v59 = vpop.xlane.xlu0 %1158  ;;  %v1230_v62 = vmul.f32 0.015625, %v1162_v56  ;;  %v1231_v6 = vmul.f32 0.015625, %v1165_v55  ;;  %v1453_v55 = vsel %vm976_vm0, %v1285_v32, 0.0  ;;  %v1450_v56 = vsel %vm976_vm0, %v1284_v26, 0.0 }
 0x1cb   : > { %v1229_v63 = vmul.f32 0.015625, %v1159_v59 }
 0x1cc   : > { %v1767_v7 = vperm.slane %v1230_v62, %v3091_v50  ;;  %v1769_v17 = vperm.slane %v1231_v6, %v3096_v53  ;;  %v1289_v62 = vld [vmem:[%s3129_s18 + $0x1c0] sm:$0xff] }
 0x1cd   : > { %v1765_v4 = vperm.slane %v1229_v63, %v3100_v58  ;;  %v1288_v63 = vld [vmem:[%s3129_s18 + $0x1b8] sm:$0xff]  ;;  %v1465_v11 = vsel %vm976_vm0, %v1289_v62, 0.0 }
 0x1ce   : > { %1427 = vadd.xlane.f32.xlu2 %v1426_v60  ;;  %1424 = vadd.xlane.f32.xlu1 %v1423_v0  ;;  %v1462_v12 = vsel %vm976_vm0, %v1288_v63, 0.0 }
 0x1cf   : > { %1421 = vadd.xlane.f32.xlu0 %v1420_v3  ;;  %v1766_v10 = vsel %vm3649_vm11, %v1765_v4, %v1764_v9  ;;  %vm3636_vm11 = vcmask 1043459   ;;  %v1287_v4 = vld [vmem:[%s3129_s18 + $0x1b0] sm:$0xff] }
 0x1d0   : > { %v1768_v21 = vsel %vm1670_vm13, %v1767_v7, %v1766_v10 }
 0x1d1   : > { %v1302_v13 = vpop.xlane.xlu2 %1301  ;;  %v1299_v14 = vpop.xlane.xlu1 %1298  ;;  %v1770_v37 = vsel %vm1674_vm14, %v1769_v17, %v1768_v21  ;;  %v1291_v21 = vld [vmem:[%s3129_s18 + $0x1d0] sm:$0xff] }
 0x1d2   : > { %v1490_v18 = vmul.f32 0.015625, %v1302_v13  ;;  %v1489_v19 = vmul.f32 0.015625, %v1299_v14  ;;  %v1168_v20 = vpop.xlane.xlu0 %1167  ;;  %v1459_v14 = vsel %vm976_vm0, %v1287_v4, 0.0 }
 0x1d3   : > { %v1232_v22 = vmul.f32 0.015625, %v1168_v20  ;;  %v1277_v20 = vld [vmem:[%s3129_s18 + $0x160] sm:$0xff] }
 0x1d4   : > { %v1846_v28 = vperm.slane %v1490_v18, %v3023_v43  ;;  %v1845_v30 = vperm.slane %v1489_v19, %v3015_v36 }
 0x1d5   : > { %v1771_v34 = vperm.slane %v1232_v22, %v3115_v16 }
 0x1d6   : > { %v1847_v35 = vsel %vm1622_vm1, %v1846_v28, %v1845_v30  ;;  %1448 = vadd.xlane.f32.xlu2 %v1447_v23  ;;  %1445 = vadd.xlane.f32.xlu1 %v1444_v25  ;;  %v1290_v28 = vld [vmem:[%s3129_s18 + $0x1c8] sm:$0xff] }
 0x1d7   : > { %v1772_v38 = vsel %vm1678_vm15, %v1771_v34, %v1770_v37  ;;  %1442 = vadd.xlane.f32.xlu0 %v1441_v33  ;;  %v1429_v37 = vsel %vm976_vm0, %v1277_v20, 0.0  ;;  %v1468_v40 = vsel %vm976_vm0, %v1290_v28, 0.0  ;;  %v1296_v28 = vld [vmem:[%s3129_s18 + $0x1f8] sm:$0xff] }
 0x1d8   : > { %v1778_v39 = vsel %vm3636_vm11, %v1772_v38, %v3259_v29  ;;  %v1471_v38 = vsel %vm976_vm0, %v1291_v21, 0.0  ;;  %vm3650_vm11 = vcmask 851712  }
 0x1d9   : > { %1780 = vst [vmem:[%s893_s20] sm:$0xf] %v1778_v39  ;;  %v1311_v42 = vpop.xlane.xlu2 %1310  ;;  %v1308_v44 = vpop.xlane.xlu1 %1307 }
 0x1da   : > { %v1493_v46 = vmul.f32 0.015625, %v1311_v42  ;;  %v1492_v48 = vmul.f32 0.015625, %v1308_v44  ;;  %v1305_v49 = vpop.xlane.xlu0 %1304 }
 0x1db   : > { %v1491_v51 = vmul.f32 0.015625, %v1305_v49 }
 0x1dc   : > { %v1850_v29 = vperm.slane %v1492_v48, %v3020_v41  ;;  %v1852_v57 = vperm.slane %v1493_v46, %v3035_v54  ;;  %v1278_v46 = vld [vmem:[%s3129_s18 + $0x168] sm:$0xff]  ;;  %v1293_v48 = vld [vmem:[%s3129_s18 + $0x1e0] sm:$0xff] }
 0x1dd   : > { %v1848_v59 = vperm.slane %v1491_v51, %v3027_v45 }
 0x1de   : > { %1457 = vadd.xlane.f32.xlu2 %v1456_v52  ;;  %1454 = vadd.xlane.f32.xlu1 %v1453_v55  ;;  %v1292_v55 = vld [vmem:[%s3129_s18 + $0x1d8] sm:$0xff] }
 0x1df   : > { %v1849_v60 = vsel %vm1626_vm2, %v1848_v59, %v1847_v35  ;;  %1451 = vadd.xlane.f32.xlu0 %v1450_v56  ;;  %v1474_v63 = vsel %vm976_vm0, %v1292_v55, 0.0 }
 0x1e0   : > { %v1851_v61 = vsel %vm1630_vm3, %v1850_v29, %v1849_v60  ;;  %v1432_v60 = vsel %vm976_vm0, %v1278_v46, 0.0 }
 0x1e1   : > { %v1320_v0 = vpop.xlane.xlu2 %1319  ;;  %v1317_v2 = vpop.xlane.xlu1 %1316  ;;  %v1853_v3 = vsel %vm1634_vm4, %v1852_v57, %v1851_v61  ;;  %v1477_v61 = vsel %vm976_vm0, %v1293_v48, 0.0 }
 0x1e2   : > { %v1496_v6 = vmul.f32 0.015625, %v1320_v0  ;;  %v1495_v7 = vmul.f32 0.015625, %v1317_v2  ;;  %v1314_v9 = vpop.xlane.xlu0 %1313 }
 0x1e3   : > { %v1494_v10 = vmul.f32 0.015625, %v1314_v9 }
 0x1e4   : > { %v1856_v13 = vperm.slane %v1495_v7, %v3056_v8  ;;  %v1858_v15 = vperm.slane %v1496_v6, %v3047_v1  ;;  %v1294_v6 = vld [vmem:[%s3129_s18 + $0x1e8] sm:$0xff]  ;;  %v1280_v7 = vld [vmem:[%s3129_s18 + $0x178] sm:$0xff] }
 0x1e5   : > { %v1854_v17 = vperm.slane %v1494_v10, %v3030_v47 }
 0x1e6   : > { %1466 = vadd.xlane.f32.xlu2 %v1465_v11  ;;  %1463 = vadd.xlane.f32.xlu1 %v1462_v12  ;;  %v1279_v12 = vld [vmem:[%s3129_s18 + $0x170] sm:$0xff] }
 0x1e7   : > { %v1855_v18 = vsel %vm1638_vm5, %v1854_v17, %v1853_v3  ;;  %1460 = vadd.xlane.f32.xlu0 %v1459_v14  ;;  %v1480_v17 = vsel %vm976_vm0, %v1294_v6, 0.0  ;;  %v1435_v20 = vsel %vm976_vm0, %v1279_v12, 0.0 }
 0x1e8   : > { %v1857_v19 = vsel %vm1642_vm6, %v1856_v13, %v1855_v18  ;;  %v1438_v18 = vsel %vm976_vm0, %v1280_v7, 0.0 }
 0x1e9   : > { %v1329_v22 = vpop.xlane.xlu2 %1328  ;;  %v1326_v23 = vpop.xlane.xlu1 %1325  ;;  %v1859_v25 = vsel %vm1646_vm7, %v1858_v15, %v1857_v19 }
 0x1ea   : > { %v1499_v30 = vmul.f32 0.015625, %v1329_v22  ;;  %v1498_v33 = vmul.f32 0.015625, %v1326_v23  ;;  %v1323_v34 = vpop.xlane.xlu0 %1322 }
 0x1eb   : > { %v1497_v35 = vmul.f32 0.015625, %v1323_v34  ;;  %v1295_v34 = vld [vmem:[%s3129_s18 + $0x1f0] sm:$0xff] }
 0x1ec   : > { %v1862_v39 = vperm.slane %v1498_v33, %v3079_v31  ;;  %v1864_v32 = vperm.slane %v1499_v30, %v3070_v24 }
 0x1ed   : > { %v1860_v42 = vperm.slane %v1497_v35, %v3053_v5 }
 0x1ee   : > { %1430 = vadd.xlane.f32.xlu2 %v1429_v37  ;;  %1472 = vadd.xlane.f32.xlu1 %v1471_v38 }
 0x1ef   : > { %v1861_v44 = vsel %vm1650_vm8, %v1860_v42, %v1859_v25  ;;  %1469 = vadd.xlane.f32.xlu0 %v1468_v40 }
 0x1f0   : > { %v1863_v26 = vsel %vm1654_vm9, %v1862_v39, %v1861_v44  ;;  %v1483_v44 = vsel %vm976_vm0, %v1295_v34, 0.0 }
 0x1f1   : > { %v1338_v49 = vpop.xlane.xlu2 %1337  ;;  %v1335_v51 = vpop.xlane.xlu1 %1334  ;;  %v1865_v52 = vsel %vm1658_vm10, %v1864_v32, %v1863_v26  ;;  %v1486_v32 = vsel %vm976_vm0, %v1296_v28, 0.0  ;;  %vm3651_vm0 = vmmov %vm3648_vm12 }
 0x1f2   : > { %v1502_v29 = vmul.f32 0.015625, %v1338_v49  ;;  %v1501_v56 = vmul.f32 0.015625, %v1335_v51  ;;  %v1332_v57 = vpop.xlane.xlu0 %1331 }
 0x1f3   : > { %v1500_v59 = vmul.f32 0.015625, %v1332_v57 }
 0x1f4   : > { %v1868_v62 = vperm.slane %v1501_v56, %v3100_v58  ;;  %v1870_v0 = vperm.slane %v1502_v29, %v3091_v50 }
 0x1f5   : > { %v1866_v2 = vperm.slane %v1500_v59, %v3075_v27 }
 0x1f6   : > { %1433 = vadd.xlane.f32.xlu1 %v1432_v60  ;;  %1478 = vadd.xlane.f32.xlu2 %v1477_v61 }
 0x1f7   : > { %v1867_v3 = vsel %vm3648_vm12, %v1866_v2, %v1865_v52  ;;  %1475 = vadd.xlane.f32.xlu0 %v1474_v63  ;;  %vm3652_vm12 = vcmask 1041409  }
 0x1f8   : > { %v1869_v4 = vsel %vm3650_vm11, %v1868_v62, %v1867_v3 }
 0x1f9   : > { %v1347_v9 = vpop.xlane.xlu2 %1346  ;;  %v1344_v10 = vpop.xlane.xlu1 %1343  ;;  %v1871_v11 = vsel %vm1670_vm13, %v1870_v0, %v1869_v4 }
 0x1fa   : > { %v1504_v13 = vmul.f32 0.015625, %v1344_v10  ;;  %v1341_v14 = vpop.xlane.xlu0 %1340  ;;  %v1505_v22 = vmul.f32 0.015625, %v1347_v9 }
 0x1fb   : > { %v1503_v15 = vmul.f32 0.015625, %v1341_v14 }
 0x1fc   : > { %v1874_v19 = vperm.slane %v1504_v13, %v3115_v16  ;;  %v1876_v39 = vperm.slane %v1505_v22, %v3015_v36 }
 0x1fd   : > { %v1872_v21 = vperm.slane %v1503_v15, %v3096_v53 }
 0x1fe   : > { %1481 = vadd.xlane.f32.xlu1 %v1480_v17  ;;  %1439 = vadd.xlane.f32.xlu2 %v1438_v18 }
 0x1ff   : > { %v1873_v23 = vsel %vm1674_vm14, %v1872_v21, %v1871_v11  ;;  %1436 = vadd.xlane.f32.xlu0 %v1435_v20 }
 0x200   : > { %v3396_v25 = vsel %vm1678_vm15, %v1874_v19, %v1873_v23 }
 0x201   : > { %v1356_v30 = vpop.xlane.xlu2 %1355  ;;  %v1353_v33 = vpop.xlane.xlu1 %1352 }
 0x202   : > { %v1508_v35 = vmul.f32 0.015625, %v1356_v30  ;;  %v1507_v37 = vmul.f32 0.015625, %v1353_v33  ;;  %v1350_v38 = vpop.xlane.xlu0 %1349 }
 0x203   : > { %v1506_v40 = vmul.f32 0.015625, %v1350_v38 }
 0x204   : > { %v1879_v42 = vperm.slane %v1507_v37, %v3027_v45  ;;  %v1881_v26 = vperm.slane %v1508_v35, %v3020_v41 }
 0x205   : > { %v1877_v46 = vperm.slane %v1506_v40, %v3023_v43 }
 0x206   : > { %1487 = vadd.xlane.f32.xlu1 %v1486_v32 }
 0x207   : > { %v1878_v48 = vsel %vm1622_vm1, %v1877_v46, %v1876_v39  ;;  %1484 = vadd.xlane.f32.xlu0 %v1483_v44 }
 0x208   : > { %v1880_v49 = vsel %vm1626_vm2, %v1879_v42, %v1878_v48 }
 0x209   : > { %v1365_v51 = vpop.xlane.xlu2 %1364  ;;  %v1362_v52 = vpop.xlane.xlu1 %1361  ;;  %v1882_v55 = vsel %vm1630_vm3, %v1881_v26, %v1880_v49 }
 0x20a   : > { %v1511_v29 = vmul.f32 0.015625, %v1365_v51  ;;  %v1510_v56 = vmul.f32 0.015625, %v1362_v52  ;;  %v1359_v57 = vpop.xlane.xlu0 %1358 }
 0x20b   : > { %v1509_v59 = vmul.f32 0.015625, %v1359_v57 }
 0x20c   : > { %v1885_v60 = vperm.slane %v1510_v56, %v3030_v47  ;;  %v1887_v61 = vperm.slane %v1511_v29, %v3056_v8 }
 0x20d   : > { %v1883_v62 = vperm.slane %v1509_v59, %v3035_v54 }
 0x20f   : > { %v1884_v63 = vsel %vm1634_vm4, %v1883_v62, %v1882_v55 }
 0x210   : > { %v1886_v0 = vsel %vm1638_vm5, %v1885_v60, %v1884_v63 }
 0x211   : > { %v1374_v2 = vpop.xlane.xlu2 %1373  ;;  %v1371_v3 = vpop.xlane.xlu1 %1370  ;;  %v1888_v4 = vsel %vm1642_vm6, %v1887_v61, %v1886_v0 }
 0x212   : > { %v1514_v6 = vmul.f32 0.015625, %v1374_v2  ;;  %v1513_v7 = vmul.f32 0.015625, %v1371_v3  ;;  %v1368_v9 = vpop.xlane.xlu0 %1367 }
 0x213   : > { %v1512_v10 = vmul.f32 0.015625, %v1368_v9 }
 0x214   : > { %v1891_v11 = vperm.slane %v1513_v7, %v3053_v5  ;;  %v1893_v12 = vperm.slane %v1514_v6, %v3079_v31 }
 0x215   : > { %v1889_v13 = vperm.slane %v1512_v10, %v3047_v1 }
 0x217   : > { %v1890_v14 = vsel %vm1646_vm7, %v1889_v13, %v1888_v4 }
 0x218   : > { %v1892_v15 = vsel %vm1650_vm8, %v1891_v11, %v1890_v14 }
 0x219   : > { %v1383_v17 = vpop.xlane.xlu2 %1382  ;;  %v1380_v18 = vpop.xlane.xlu1 %1379  ;;  %v1894_v19 = vsel %vm1654_vm9, %v1893_v12, %v1892_v15 }
 0x21a   : > { %v1517_v20 = vmul.f32 0.015625, %v1383_v17  ;;  %v1516_v21 = vmul.f32 0.015625, %v1380_v18  ;;  %v1377_v22 = vpop.xlane.xlu0 %1376 }
 0x21b   : > { %v1515_v23 = vmul.f32 0.015625, %v1377_v22 }
 0x21c   : > { %v1897_v28 = vperm.slane %v1516_v21, %v3075_v27  ;;  %v1899_v30 = vperm.slane %v1517_v20, %v3100_v58 }
 0x21d   : > { %v1895_v33 = vperm.slane %v1515_v23, %v3070_v24 }
 0x21f   : > { %v1896_v34 = vsel %vm1658_vm10, %v1895_v33, %v1894_v19 }
 0x220   : > { %v1898_v35 = vsel %vm3651_vm0, %v1897_v28, %v1896_v34 }
 0x221   : > { %v1392_v37 = vpop.xlane.xlu2 %1391  ;;  %v1389_v38 = vpop.xlane.xlu1 %1388  ;;  %v1900_v39 = vsel %vm3650_vm11, %v1899_v30, %v1898_v35 }
 0x222   : > { %v1520_v40 = vmul.f32 0.015625, %v1392_v37  ;;  %v1519_v32 = vmul.f32 0.015625, %v1389_v38  ;;  %v1386_v42 = vpop.xlane.xlu0 %1385 }
 0x223   : > { %v1518_v44 = vmul.f32 0.015625, %v1386_v42 }
 0x224   : > { %v1903_v26 = vperm.slane %v1519_v32, %v3096_v53  ;;  %v1905_v46 = vperm.slane %v1520_v40, %v3115_v16 }
 0x225   : > { %v1901_v48 = vperm.slane %v1518_v44, %v3091_v50 }
 0x227   : > { %v1902_v49 = vsel %vm1670_vm13, %v1901_v48, %v1900_v39 }
 0x228   : > { %v1904_v51 = vsel %vm1674_vm14, %v1903_v26, %v1902_v49 }
 0x229   : > { %v1906_v52 = vsel %vm1678_vm15, %v1905_v46, %v1904_v51  ;;  %v1401_v55 = vpop.xlane.xlu2 %1400  ;;  %v1398_v29 = vpop.xlane.xlu1 %1397 }
 0x22a   : > { %v1522_v56 = vmul.f32 0.015625, %v1398_v29  ;;  %v1395_v57 = vpop.xlane.xlu0 %1394  ;;  %v3440_v59 = vsel %vm3652_vm12, %v1906_v52, %v3396_v25  ;;  %v1523_v18 = vmul.f32 0.015625, %v1401_v55 }
 0x22b   : > { %v1521_v60 = vmul.f32 0.015625, %v1395_v57 }
 0x22c   : > { %v1908_v61 = vperm.slane %v1522_v56, %v3023_v43  ;;  %v1910_v20 = vperm.slane %v1523_v18, %v3027_v45 }
 0x22d   : > { %v1907_v62 = vperm.slane %v1521_v60, %v3015_v36 }
 0x22f   : > { %v1909_v63 = vsel %vm1622_vm1, %v1908_v61, %v1907_v62 }
 0x230   : > { %v1911_v38 = vsel %vm1626_vm2, %v1910_v20, %v1909_v63 }
 0x231   : > { %v1410_v0 = vpop.xlane.xlu2 %1409  ;;  %v1407_v2 = vpop.xlane.xlu1 %1406 }
 0x232   : > { %v1404_v3 = vpop.xlane.xlu0 %1403  ;;  %v1525_v21 = vmul.f32 0.015625, %v1407_v2  ;;  %v1526_v35 = vmul.f32 0.015625, %v1410_v0 }
 0x233   : > { %v1524_v19 = vmul.f32 0.015625, %v1404_v3 }
 0x234   : > { %v1914_v37 = vperm.slane %v1525_v21, %v3035_v54  ;;  %v1916_v46 = vperm.slane %v1526_v35, %v3030_v47 }
 0x235   : > { %v1912_v28 = vperm.slane %v1524_v19, %v3020_v41 }
 0x237   : > { %v1913_v40 = vsel %vm1630_vm3, %v1912_v28, %v1911_v38 }
 0x238   : > { %v1915_v48 = vsel %vm1634_vm4, %v1914_v37, %v1913_v40 }
 0x239   : > { %v1419_v4 = vpop.xlane.xlu2 %1418  ;;  %v1416_v6 = vpop.xlane.xlu1 %1415 }
 0x23a   : > { %v1413_v7 = vpop.xlane.xlu0 %1412  ;;  %v1528_v49 = vmul.f32 0.015625, %v1416_v6  ;;  %v1529_v61 = vmul.f32 0.015625, %v1419_v4 }
 0x23b   : > { %v1527_v39 = vmul.f32 0.015625, %v1413_v7 }
 0x23c   : > { %v1920_v62 = vperm.slane %v1528_v49, %v3047_v1 }
 0x23d   : > { %v1918_v51 = vperm.slane %v1527_v39, %v3056_v8 }
 0x241   : > { %v1428_v9 = vpop.xlane.xlu2 %1427  ;;  %v1425_v10 = vpop.xlane.xlu1 %1424 }
 0x242   : > { %v1422_v11 = vpop.xlane.xlu0 %1421  ;;  %v1531_v4 = vmul.f32 0.015625, %v1425_v10  ;;  %v1532_v19 = vmul.f32 0.015625, %v1428_v9 }
 0x243   : > { %v1530_v2 = vmul.f32 0.015625, %v1422_v11 }
 0x244   : > { %v1926_v28 = vperm.slane %v1531_v4, %v3070_v24 }
 0x249   : > { %v1449_v12 = vpop.xlane.xlu2 %1448  ;;  %v1446_v13 = vpop.xlane.xlu1 %1445 }
 0x24a   : > { %v1443_v25 = vpop.xlane.xlu0 %1442  ;;  %v1538_v33 = vmul.f32 0.015625, %v1446_v13  ;;  %v1539_v32 = vmul.f32 0.015625, %v1449_v12  ;;  %v1922_v12 = vperm.slane %v1529_v61, %v3053_v5 }
 0x24b   : > { %v1537_v34 = vmul.f32 0.015625, %v1443_v25 }
 0x24c   : > { %v1939_v42 = vperm.slane %v1538_v33, %v3023_v43  ;;  %v1941_v29 = vperm.slane %v1539_v32, %v3027_v45 }
 0x24d   : > { %v1938_v44 = vperm.slane %v1537_v34, %v3015_v36  ;;  %v1917_v36 = vsel %vm1638_vm5, %v1916_v46, %v1915_v48 }
 0x24e   : > { %v1919_v63 = vsel %vm1642_vm6, %v1918_v51, %v1917_v36 }
 0x24f   : > { %v1940_v60 = vsel %vm1622_vm1, %v1939_v42, %v1938_v44  ;;  %vm3653_vm1 = vmmov %vm3651_vm0 }
 0x250   : > { %v1942_v6 = vsel %vm1626_vm2, %v1941_v29, %v1940_v60  ;;  %vm3654_vm2 = vmmov %vm3650_vm11 }
 0x251   : > { %v1458_v14 = vpop.xlane.xlu2 %1457  ;;  %v1455_v15 = vpop.xlane.xlu1 %1454 }
 0x252   : > { %v1452_v17 = vpop.xlane.xlu0 %1451  ;;  %v1541_v56 = vmul.f32 0.015625, %v1455_v15  ;;  %v1542_v0 = vmul.f32 0.015625, %v1458_v14  ;;  %v1924_v14 = vperm.slane %v1530_v2, %v3079_v31 }
 0x253   : > { %v1540_v26 = vmul.f32 0.015625, %v1452_v17 }
 0x254   : > { %v1945_v3 = vperm.slane %v1541_v56, %v3035_v54  ;;  %v1947_v13 = vperm.slane %v1542_v0, %v3030_v47 }
 0x255   : > { %v1943_v43 = vperm.slane %v1540_v26, %v3020_v41  ;;  %v1921_v41 = vsel %vm1646_vm7, %v1920_v62, %v1919_v63 }
 0x256   : > { %v1923_v20 = vsel %vm1650_vm8, %v1922_v12, %v1921_v41 }
 0x257   : > { %v1944_v7 = vsel %vm1630_vm3, %v1943_v43, %v1942_v6  ;;  %vm3655_vm3 = vcmask 1042434  }
 0x258   : > { %v1946_v11 = vsel %vm1634_vm4, %v1945_v3, %v1944_v7  ;;  %vm3656_vm4 = vmmov %vm3651_vm0 }
 0x259   : > { %v1467_v22 = vpop.xlane.xlu2 %1466  ;;  %v1464_v23 = vpop.xlane.xlu1 %1463  ;;  %v1948_v47 = vsel %vm1638_vm5, %v1947_v13, %v1946_v11  ;;  %vm3657_vm5 = vmmov %vm3654_vm2 }
 0x25a   : > { %v1461_v30 = vpop.xlane.xlu0 %1460  ;;  %v1544_v25 = vmul.f32 0.015625, %v1464_v23  ;;  %v1545_v21 = vmul.f32 0.015625, %v1467_v22 }
 0x25b   : > { %v1543_v45 = vmul.f32 0.015625, %v1461_v30  ;;  %v1925_v30 = vsel %vm1654_vm9, %v1924_v14, %v1923_v20 }
 0x25c   : > { %v1951_v10 = vperm.slane %v1544_v25, %v3047_v1  ;;  %v1953_v9 = vperm.slane %v1545_v21, %v3053_v5  ;;  %v1927_v37 = vsel %vm1658_vm10, %v1926_v28, %v1925_v30 }
 0x25d   : > { %v1949_v54 = vperm.slane %v1543_v45, %v3056_v8  ;;  %v1928_v8 = vperm.slane %v1532_v19, %v3075_v27 }
 0x25f   : > { %v1950_v33 = vsel %vm1642_vm6, %v1949_v54, %v1948_v47  ;;  %v1929_v49 = vsel %vm3653_vm1, %v1928_v8, %v1927_v37  ;;  %vm3658_vm6 = vcmask 1043459  }
 0x260   : > { %v1952_v22 = vsel %vm1646_vm7, %v1951_v10, %v1950_v33 }
 0x261   : > { %v1431_v52 = vpop.xlane.xlu2 %1430  ;;  %v1473_v55 = vpop.xlane.xlu1 %1472  ;;  %v1954_v5 = vsel %vm1650_vm8, %v1953_v9, %v1952_v22 }
 0x262   : > { %v1470_v57 = vpop.xlane.xlu0 %1469  ;;  %v1533_v23 = vmul.f32 0.015625, %v1431_v52  ;;  %v1547_v1 = vmul.f32 0.015625, %v1473_v55 }
 0x263   : > { %v1546_v34 = vmul.f32 0.015625, %v1470_v57 }
 0x264   : > { %v1930_v38 = vperm.slane %v1533_v23, %v3100_v58  ;;  %v1957_v55 = vperm.slane %v1547_v1, %v3070_v24 }
 0x265   : > { %v1955_v32 = vperm.slane %v1546_v34, %v3079_v31 }
 0x266   : > { %v1931_v52 = vsel %vm3654_vm2, %v1930_v38, %v1929_v49 }
 0x267   : > { %v1956_v31 = vsel %vm1654_vm9, %v1955_v32, %v1954_v5 }
 0x268   : > { %v1958_v62 = vsel %vm1658_vm10, %v1957_v55, %v1956_v31 }
 0x269   : > { %v1434_v15 = vpop.xlane.xlu1 %1433  ;;  %v1479_v17 = vpop.xlane.xlu2 %1478 }
 0x26a   : > { %v1476_v18 = vpop.xlane.xlu0 %1475  ;;  %v1534_v35 = vmul.f32 0.015625, %v1434_v15  ;;  %v1549_v29 = vmul.f32 0.015625, %v1479_v17 }
 0x26b   : > { %v1548_v44 = vmul.f32 0.015625, %v1476_v18 }
 0x26c   : > { %v1932_v42 = vperm.slane %v1534_v35, %v3091_v50  ;;  %v1961_v63 = vperm.slane %v1549_v29, %v3100_v58 }
 0x26d   : > { %v1959_v60 = vperm.slane %v1548_v44, %v3075_v27 }
 0x26e   : > { %v1933_v57 = vsel %vm1670_vm13, %v1932_v42, %v1931_v52 }
 0x26f   : > { %v1960_v2 = vsel %vm3656_vm4, %v1959_v60, %v1958_v62 }
 0x270   : > { %v1962_v12 = vsel %vm3657_vm5, %v1961_v63, %v1960_v2 }
 0x271   : > { %v1482_v39 = vpop.xlane.xlu1 %1481  ;;  %v1440_v40 = vpop.xlane.xlu2 %1439 }
 0x272   : > { %v1437_v26 = vpop.xlane.xlu0 %1436  ;;  %v1536_v46 = vmul.f32 0.015625, %v1440_v40  ;;  %v1550_v43 = vmul.f32 0.015625, %v1482_v39 }
 0x273   : > { %v1535_v48 = vmul.f32 0.015625, %v1437_v26 }
 0x274   : > { %v1936_v51 = vperm.slane %v1536_v46, %v3115_v16  ;;  %v1963_v3 = vperm.slane %v1550_v43, %v3091_v50 }
 0x275   : > { %v1934_v56 = vperm.slane %v1535_v48, %v3096_v53 }
 0x276   : > { %v1964_v58 = vsel %vm1670_vm13, %v1963_v3, %v1962_v12 }
 0x277   : > { %v1935_v61 = vsel %vm1674_vm14, %v1934_v56, %v1933_v57 }
 0x278   : > { %v1937_v36 = vsel %vm1678_vm15, %v1936_v51, %v1935_v61 }
 0x279   : > { %v1970_v24 = vsel %vm3655_vm3, %v1937_v36, %v3440_v59  ;;  %v1488_v0 = vpop.xlane.xlu1 %1487 }
 0x27a   : > { %v1485_v27 = vpop.xlane.xlu0 %1484  ;;  %v1552_v6 = vmul.f32 0.015625, %v1488_v0 }
 0x27b   : > { %v1551_v45 = vmul.f32 0.015625, %v1485_v27 }
 0x27c   : > { %v1967_v7 = vperm.slane %v1552_v6, %v3115_v16 }
 0x27d   : > { %v1965_v41 = vperm.slane %v1551_v45, %v3096_v53 }
 0x27e   : > { %1977 = sbr.rel (%p2305_p1) target bundleno = 645 (0x285), region = 116 }
 0x27f   : > { %v1966_v4 = vsel %vm1674_vm14, %v1965_v41, %v1964_v58 }
 0x280   : > { %v1968_v59 = vsel %vm1678_vm15, %v1967_v7, %v1966_v4 }
 0x281   : > { %v3507_v13 = vsel %vm3658_vm6, %v1968_v59, %v1970_v24 }
 0x282   : > { %1973 = vst [vmem:[%s3638_s8] sm:$0xf] %v3507_v13 }
 0x283   : > { %v2526_v50 = vmov 0.0  }
 0x284   : > { %1978 = vst [vmem:[#allocation2] sm:$0xff] %v2526_v50 }
 0x285 PF: > { %v2011_v53 = vld [vmem:[%s3405_s14 + $0xf8] sm:$0xff]  ;;  %v2010_v16 = vld [vmem:[%s3405_s14 + $0xf0] sm:$0xff]  ;;  %v2009_v25 = vld [vmem:[%s3405_s14 + $0xe8] sm:$0xff]  ;;  %vm2055_vm7 = vcmask 1043456   ;;  %p2306_p2 = scmp.ne.s32.totalorder %s2516_s24, 1 }
 0x286   : > { %2032 = vmatpush.msra.mxu1 %v2011_v53  ;;  %2012 = vmatpush.msra.mxu0 %v2010_v16  ;;  %v2008_v15 = vld [vmem:[%s3405_s14 + $0xe0] sm:$0xff]  ;;  %v2007_v17 = vld [vmem:[%s3405_s14 + $0xd8] sm:$0xff]  ;;  %v2006_v14 = vld [vmem:[%s3405_s14 + $0xd0] sm:$0xff] }
 0x287   : > { %v2005_v11 = vld [vmem:[%s3405_s14 + $0xc8] sm:$0xff]  ;;  %v2004_v54 = vld [vmem:[%s3405_s14 + $0xc0] sm:$0xff]  ;;  %v2003_v18 = vld [vmem:[%s3405_s14 + $0xb8] sm:$0xff] }
 0x288   : > { %2033 = vmatpush.msra.mxu1 %v2009_v25  ;;  %2013 = vmatpush.msra.mxu0 %v2008_v15  ;;  %v2002_v19 = vld [vmem:[%s3405_s14 + $0xb0] sm:$0xff]  ;;  %v2001_v20 = vld [vmem:[%s3405_s14 + $0xa8] sm:$0xff]  ;;  %v2000_v21 = vld [vmem:[%s3405_s14 + $0xa0] sm:$0xff] }
 0x289   : > { %v1999_v28 = vld [vmem:[%s3405_s14 + $0x98] sm:$0xff]  ;;  %v1998_v10 = vld [vmem:[%s3405_s14 + $0x90] sm:$0xff]  ;;  %v1997_v47 = vld [vmem:[%s3405_s14 + $0x88] sm:$0xff] }
 0x28a   : > { %2034 = vmatpush.msra.mxu1 %v2007_v17  ;;  %2014 = vmatpush.msra.mxu0 %v2006_v14  ;;  %v1996_v23 = vld [vmem:[%s3405_s14 + $0x80] sm:$0xff]  ;;  %v1995_v30 = vld [vmem:[%s3405_s14 + $0x78] sm:$0xff]  ;;  %v1994_v33 = vld [vmem:[%s3405_s14 + $0x70] sm:$0xff] }
 0x28b   : > { %v1993_v34 = vld [vmem:[%s3405_s14 + $0x68] sm:$0xff]  ;;  %v1992_v35 = vld [vmem:[%s3405_s14 + $0x60] sm:$0xff]  ;;  %v1991_v8 = vld [vmem:[%s3405_s14 + $0x58] sm:$0xff] }
 0x28c   : > { %2035 = vmatpush.msra.mxu1 %v2005_v11  ;;  %2015 = vmatpush.msra.mxu0 %v2004_v54  ;;  %v1990_v9 = vld [vmem:[%s3405_s14 + $0x50] sm:$0xff]  ;;  %v1989_v37 = vld [vmem:[%s3405_s14 + $0x48] sm:$0xff]  ;;  %v1988_v22 = vld [vmem:[%s3405_s14 + $0x40] sm:$0xff] }
 0x28d   : > { %v1987_v38 = vld [vmem:[%s3405_s14 + $0x38] sm:$0xff]  ;;  %v1986_v1 = vld [vmem:[%s3405_s14 + $0x30] sm:$0xff]  ;;  %v1985_v39 = vld [vmem:[%s3405_s14 + $0x28] sm:$0xff] }
 0x28e   : > { %2036 = vmatpush.msra.mxu1 %v2003_v18  ;;  %2016 = vmatpush.msra.mxu0 %v2002_v19  ;;  %v1984_v40 = vld [vmem:[%s3405_s14 + $0x20] sm:$0xff]  ;;  %v1983_v32 = vld [vmem:[%s3405_s14 + $0x18] sm:$0xff]  ;;  %v1982_v42 = vld [vmem:[%s3405_s14 + $0x10] sm:$0xff] }
 0x28f   : > { %v1981_v44 = vld [vmem:[%s3405_s14 + $0x8] sm:$0xff]  ;;  %v1980_v26 = vld [vmem:[%s3405_s14] sm:$0xff] }
 0x290   : > { %2037 = vmatpush.msra.mxu1 %v2001_v20  ;;  %2017 = vmatpush.msra.mxu0 %v2000_v21  ;;  %v1979_v5 = vld [vmem:[#allocation2] sm:$0xff] }
 0x292   : > { %2038 = vmatpush.msra.mxu1 %v1999_v28  ;;  %2018 = vmatpush.msra.mxu0 %v1998_v10 }
 0x294   : > { %2039 = vmatpush.msra.mxu1 %v1997_v47  ;;  %2019 = vmatpush.msra.mxu0 %v1996_v23 }
 0x296   : > { %2040 = vmatpush.msra.mxu1 %v1995_v30  ;;  %2020 = vmatpush.msra.mxu0 %v1994_v33 }
 0x298   : > { %2041 = vmatpush.msra.mxu1 %v1993_v34  ;;  %2021 = vmatpush.msra.mxu0 %v1992_v35 }
 0x29a   : > { %2042 = vmatpush.msra.mxu1 %v1991_v8  ;;  %2022 = vmatpush.msra.mxu0 %v1990_v9 }
 0x29c   : > { %2043 = vmatpush.msra.mxu1 %v1989_v37  ;;  %2023 = vmatpush.msra.mxu0 %v1988_v22 }
 0x29e   : > { %2044 = vmatpush.msra.mxu1 %v1987_v38  ;;  %2024 = vmatpush.msra.mxu0 %v1986_v1 }
 0x2a0   : > { %2045 = vmatpush.msra.mxu1 %v1985_v39  ;;  %2025 = vmatpush.msra.mxu0 %v1984_v40 }
 0x2a2   : > { %2046 = vmatpush.msra.mxu1 %v1983_v32  ;;  %2026 = vmatpush.msra.mxu0 %v1982_v42 }
 0x2a4   : > { %2047 = vmatpush.msra.mxu1 %v1981_v44  ;;  %2027 = vmatpush.msra.mxu0 %v1980_v26 }
 0x2a5   : > { %2048 = vmatmul.f32.vlgmr.msra.gmra.mxu1 %v3507_v13  ;;  %2028 = vmatmul.f32.vlgmr.msra.gmra.mxu0 %v3507_v13 }
 0x322   : > { %v2049_v46 = vpop.f32.mrf.mxu1  ;;  %v2029_v48 = vpop.f32.mrf.mxu0 }
 0x323   : > { %v2054_v49 = vrot.slane %v2049_v46, 4 }
 0x324   : > { %2063 = sbr.rel (%p2306_p2) target bundleno = 819 (0x333), region = 120 }
 0x325   : > { %v2056_v51 = vsel %vm2055_vm7, %v2029_v48, %v2054_v49 }
 0x326   : > { %v2058_v52 = vadd.f32 %v2056_v51, %v1979_v5 }
 0x328   : > { %2059 = vst [vmem:[#allocation2] sm:$0xff] %v2058_v52 }
 0x329   : > { %v2065_v55 = vld [vmem:[%s3628_s3] sm:$0x3] }
 0x32a   : > { %v2067_v29 = vperm.slane %v2065_v55, 0  ;;  %v2068_v56 = vperm.slane %v2065_v55, 1 }
 0x32c   : > { %v2069_v57 = vrot.slane %v2068_v56, 4 }
 0x32e   : > { %v2070_v60 = vsel %vm2055_vm7, %v2067_v29, %v2069_v57 }
 0x32f   : > { %v2064_v31 = vld [vmem:[#allocation2] sm:$0xff] }
 0x330   : > { %v2072_v43 = vadd.f32 %v2070_v60, %v2064_v31 }
 0x332   : > { %2073 = vst [vmem:[#allocation5] sm:$0xff] %v2072_v43 }
 0x333 PF: > { %s3554_s17 = sand.u32 1, %s2287_s27   ;;  %s2310_s18 = sshll.u32 %s2516_s24, 2 }
 0x334   : > { %s2107_s10 = scalar_lea.hbm %s3630_s5, %s2310_s18  ;;  %s2109_s13 = sshll.u32 %s893_s20, 4  ;;  %s2110_s13 = int_to_ptr.vmem [resolvable:$true] %s2109_s13 }
 0x335   : > { %s2111_s14 = sshll.u32 %s2107_s10, 4  ;;  %s2075_s15 = scalar_lea.sflag [#allocation8], %s3554_s17  ;;  %s2112_s14 = int_to_ptr.hbm [resolvable:$true] %s2111_s14 }
 0x336   : > { %s2400_s16 = sshra.s32 %s2112_s14, 4  ;;  %s2406_s24 = scalar_lea.hbm %s3630_s5, 8  ;;  %s2401_s16 = int_to_ptr.hbm [resolvable:$true] %s2400_s16 }
 0x337   : > { %s2402_s28 = scalar_lea.hbm %s2401_s16, 4  ;;  %p2407_p8 = scmp.lt.s32.totalorder %s2401_s16, %s3630_s5 }
 0x338   : > { %p2403_p4 = scmp.ne.s32.totalorder %s2401_s16, %s2402_s28  ;;  %p2408_p11 = scmp.lt.s32.totalorder %s2406_s24, %s2402_s28 }
 0x33a   : > { %p2404_p6 = pnand %p2403_p4, %p2612_p5  ;;  %p2409_p12 = por %p2408_p11, %p2407_p8 }
 0x33c   : > { %p2405_p7 = pneg %p2404_p6 }
 0x33e   : > { %p2410_p13 = pnand %p2409_p12, %p2405_p7 }
 0x340   : > { %2413 = shalt.err (!%p2410_p13)
}
 0x341   : > { %2320 = dma.vmem_to_hbm [thread:$0]  (%p2612_p5), %s2110_s13, 64, %s2112_s14, %s2075_s15  }
 0x342   : > { %s2527_s20 = smov [#allocation5]   ;;  %s2095_s27 = sshll.u32 %s3629_s4, 4  ;;  %s2096_s27 = int_to_ptr.hbm [resolvable:$true] %s2095_s27 }
 0x343   : > { %s2093_s30 = sshll.u32 %s2527_s20, 4  ;;  %s2123_s16 = scalar_lea.hbm %s3631_s6, %s2310_s18  ;;  %s2094_s30 = int_to_ptr.vmem [resolvable:$true] %s2093_s30 }
 0x344   : > { %2319 = dma.vmem_to_hbm [thread:$0]  (%p2600_p3), %s2094_s30, 128, %s2096_s27, [#allocation6]  }
 0x345   : > { %s3659_s24 = scalar_lea.vmem [#allocation9], %s3321_s19  ;;  %s2127_s1 = sshll.u32 %s2123_s16, 4  ;;  %s2128_s1 = int_to_ptr.hbm [resolvable:$true] %s2127_s1 }
 0x346   : > { %s2125_s21 = sshll.u32 %s3659_s24, 4  ;;  %s2456_s13 = sshra.s32 %s2128_s1, 4  ;;  %s2126_s21 = int_to_ptr.vmem [resolvable:$true] %s2125_s21  ;;  %s2457_s13 = int_to_ptr.hbm [resolvable:$true] %s2456_s13 }
 0x347   : > { %s2458_s14 = scalar_lea.hbm %s2457_s13, 4  ;;  %s2462_s30 = scalar_lea.hbm %s3631_s6, 8 }
 0x348   : > { %p2459_p0 = scmp.ne.s32.totalorder %s2457_s13, %s2458_s14  ;;  %p2463_p4 = scmp.lt.s32.totalorder %s2457_s13, %s3631_s6 }
 0x349   : > { %p2464_p6 = scmp.lt.s32.totalorder %s2462_s30, %s2458_s14 }
 0x34a   : > { %p2460_p1 = pnand %p2459_p0, %p2612_p5 }
 0x34b   : > { %p2465_p7 = por %p2464_p6, %p2463_p4 }
 0x34c   : > { %p2461_p2 = pneg %p2460_p1 }
 0x34e   : > { %p2466_p8 = pnand %p2465_p7, %p2461_p2 }
 0x350   : > { %2469 = shalt.err (!%p2466_p8)
}
 0x351   : > { %2321 = dma.vmem_to_hbm [thread:$0]  (%p2612_p5), %s2126_s21, 64, %s2128_s1, %s2075_s15  }
 0x352   : > { %2495 = dma.done.wait (%p2600_p3), [#allocation6], 128  }
 0x353   : > { %2497 = vsyncadd (%p2600_p3), [#allocation6], 4294967168 }
 0x354 PF: > { %s3660_s19 = sadd.s32 4294967294, %s2524_s26   ;;  %p2327_p11 = pnand %p2290_p10, %p2624_p9 }
 0x355   : > { %s2144_s18 = sand.u32 1, %s3660_s19  }
 0x356   : > { %p2328_p12 = pneg %p2327_p11  ;;  %s2145_s9 = scalar_lea.sflag [#allocation8], %s2144_s18 }
 0x358   : > { %2499 = dma.done.wait (%p2328_p12), %s2145_s9, 128  }
 0x359   : > { %2501 = vsyncadd (%p2328_p12), %s2145_s9, 4294967168  ;;  %s21_s26 = sadd.s32 1, %s2524_s26   ;;  %s3661_s21 = smov %s2508_s22 }
 0x35a   : > { %p18_p5 = scmp.ge.s32.totalorder %s21_s26, 4   ;;  %s3662_s22 = smov %s2512_s23 }
 0x35b   : > { %s3663_s23 = smov %s2622_s11  ;;  %s3664_s24 = smov %s2520_s25 }
 0x35c   : > { %s3665_s25 = smov %s3667_s29  ;;  %20 = sbr.rel (!%p18_p5) target bundleno = 8 (0x8), region = 196 }
 0x361   :  { %2161 = vsyncpa [#allocation6], 1 }
 0x362   :  { %2163 = vsyncpa [#allocation6 + $0x1], 1 }
 0x363   :  { %2164 = vsyncpa [#allocation8], 1 }
 0x364   :  { %2166 = vsyncpa [#allocation8 + $0x1], 1 }

</bundles_post_ra>
